<compile_context>
chip_gen: v7x
topology: tpu7x:2x2x1
jax: 0.10.0
libtpu: 0.0.40
codegen_flags: <defaults>
</compile_context>

<pallas_src>
import functools

import jax
import jax.numpy as jnp
import numpy as np
from jax.experimental import pallas as pl
from jax.experimental.pallas import tpu as pltpu


# ----------------------------- kernel bodies -----------------------------

def _make_attn_kernel(heads, dim_head, scale):
    inner = heads * dim_head

    def kernel(x_ref, wqkv_ref, wre_ref, bre_ref, y_ref, v_ref, stats_ref, yacc_ref):
        # qkv projection (bias-free Linear) on the MXU, f32 accumulation.
        x = x_ref[0]                                                     # (n, dim)
        qkv = jnp.dot(x, wqkv_ref[...], preferred_element_type=jnp.float32)

        # v kept packed as (n, inner): one lane-dense store; consumer slices heads
        # statically.  Stored bf16 (inter-kernel HBM traffic).
        v_ref[0] = qkv[:, 2 * inner:].astype(jnp.bfloat16)

        # Per-head scaled softmax attention, immediately folded into the 1x1-conv
        # accumulators (incremental accumulation: only one (n,n) attn map live).
        for hi in range(heads):
            lo = hi * dim_head
            q = qkv[:, lo:lo + dim_head]
            k = qkv[:, inner + lo:inner + lo + dim_head]
            s = jax.lax.dot_general(q, k, (((1,), (1,)), ((), ())),
                                    preferred_element_type=jnp.float32) * scale
            s = s - jnp.max(s, axis=-1, keepdims=True)
            e = jnp.exp(s)
            inv = pl.reciprocal(jnp.sum(e, axis=-1, keepdims=True), approx=True)
            attn = e * inv                                               # (n, n)

            # Conv2d(heads, heads, 1): K == heads is tiny -> unrolled VPU FMAs with
            # SMEM scalar weights, scattered into the per-output-channel accumulators.
            for ho in range(heads):
                w = wre_ref[ho, hi]
                if hi == 0:
                    yacc_ref[ho] = attn * w + bre_ref[ho]
                else:
                    yacc_ref[ho] = yacc_ref[ho] + attn * w

        # Store pre-BN map (bf16) and per-batch BatchNorm statistics (f32, from the
        # f32 accumulator, before the bf16 cast).
        sum_cols, sq_cols = [], []
        for ho in range(heads):
            acc = yacc_ref[ho]                                           # (n, n) f32
            y_ref[0, ho] = acc.astype(jnp.bfloat16)
            rs = jnp.sum(acc, axis=1, keepdims=True)                     # (n, 1)
            sum_cols.append(jnp.sum(rs, axis=0, keepdims=True))          # (1, 1)
            rq = jnp.sum(acc * acc, axis=1, keepdims=True)
            sq_cols.append(jnp.sum(rq, axis=0, keepdims=True))

        stats_ref[0] = jnp.concatenate(
            [jnp.concatenate(sum_cols, axis=1),
             jnp.concatenate(sq_cols, axis=1)], axis=0)                  # (2, heads)

    return kernel


def _make_out_kernel(heads, dim_head):
    def kernel(y_ref, v_ref, s_ref, t_ref, wout_ref, bout_ref, o_ref):
        v = v_ref[0]                                                     # (n, inner) bf16
        wout = wout_ref[...].astype(jnp.bfloat16)                        # (inner, dim)
        tq, dim = o_ref.shape[1], o_ref.shape[2]
        acc = jnp.zeros((tq, dim), jnp.float32)
        for h in range(heads):
            sl = slice(h * dim_head, (h + 1) * dim_head)
            # Fold w_out into the per-head attn @ v: lane-dense (n, dim) per-head
            # matmuls, no concatenate, no second full matmul pass.
            u = jnp.dot(v[:, sl], wout[sl, :],
                        preferred_element_type=jnp.float32)              # (n, dim)
            # Folded train-mode BatchNorm2d (per-channel scale/shift SMEM scalars).
            a = y_ref[0, h].astype(jnp.float32) * s_ref[h] + t_ref[h]    # (tq, n)
            acc = acc + jnp.dot(a, u, preferred_element_type=jnp.float32)
        # to_out bias (+ Dropout(p=0.0) == identity)
        o_ref[0] = acc + bout_ref[...]

    return kernel


# ----------------------------- forward -----------------------------

def reattention_forward(x, p, *, heads, dim_head, eps=1e-5, reatten_scale=1.0):
    b, n, dim = x.shape
    inner = heads * dim_head
    scale = float(dim_head) ** -0.5

    # ---- kernel 1: qkv + attention softmax + reatten 1x1 conv + per-batch BN stats ----
    y, v, stats = pl.pallas_call(
        _make_attn_kernel(heads, dim_head, scale),
        out_shape=(
            jax.ShapeDtypeStruct((b, heads, n, n), jnp.bfloat16),  # pre-BN reattention map
            jax.ShapeDtypeStruct((b, n, inner), jnp.bfloat16),     # packed v
            jax.ShapeDtypeStruct((b, 2, heads), jnp.float32),      # per-batch [sum; sumsq]
        ),
        grid=(b,),
        in_specs=[
            pl.BlockSpec((1, n, dim), lambda i: (i, 0, 0)),
            pl.BlockSpec((dim, 3 * inner), lambda i: (0, 0)),
            pl.BlockSpec(memory_space=pltpu.MemorySpace.SMEM),     # w_re (heads, heads)
            pl.BlockSpec(memory_space=pltpu.MemorySpace.SMEM),     # b_re (heads,)
        ],
        out_specs=(
            pl.BlockSpec((1, heads, n, n), lambda i: (i, 0, 0, 0)),
            pl.BlockSpec((1, n, inner), lambda i: (i, 0, 0)),
            pl.BlockSpec((1, 2, heads), lambda i: (i, 0, 0)),
        ),
        scratch_shapes=[pltpu.VMEM((heads, n, n), jnp.float32)],   # 1x1-conv accumulators
        compiler_params=pltpu.CompilerParams(
            dimension_semantics=("parallel",)),                    # b independent now
    )(x, p["w_qkv"], p["w_re"], p["b_re"])

    # TODO(synk): the BN (mean, var) -> (scale, shift) fold is a cross-batch reduction
    # boundary; done here on the tiny (b, 2, heads) stats instead of re-reading the
    # attention map from HBM.
    cnt = float(b * n * n)
    ssum = jnp.sum(stats, axis=0)                       # (2, heads)
    mean = ssum[0] / cnt
    var = jnp.maximum(ssum[1] / cnt - mean * mean, 0.0)  # biased variance, clamped
    g_inv = p["gamma"] * jax.lax.rsqrt(var + eps)
    bn_scale = g_inv * reatten_scale                    # reatten_scale == 1.0 (transform_scale=False)
    bn_shift = (p["beta"] - mean * g_inv) * reatten_scale

    # ---- kernel 2: BN affine + per-head attn @ (v_h @ w_out_h) + bias, row-tiled ----
    tq = 128 if (n % 128 == 0) else n                   # query-row tile (full n at toy sizes)
    out = pl.pallas_call(
        _make_out_kernel(heads, dim_head),
        out_shape=jax.ShapeDtypeStruct((b, n, dim), jnp.float32),
        grid=(b, n // tq),
        in_specs=[
            pl.BlockSpec((1, heads, tq, n), lambda i, r: (i, 0, r, 0)),
            pl.BlockSpec((1, n, inner), lambda i, r: (i, 0, 0)),
            pl.BlockSpec(memory_space=pltpu.MemorySpace.SMEM),     # bn_scale (heads,)
            pl.BlockSpec(memory_space=pltpu.MemorySpace.SMEM),     # bn_shift (heads,)
            pl.BlockSpec((inner, dim), lambda i, r: (0, 0)),
            pl.BlockSpec((1, dim), lambda i, r: (0, 0)),
        ],
        out_specs=pl.BlockSpec((1, tq, dim), lambda i, r: (i, r, 0)),
        compiler_params=pltpu.CompilerParams(
            dimension_semantics=("parallel", "parallel")),
    )(y, v, bn_scale, bn_shift, p["w_out"], p["b_out"][None, :])

    return out


# ----------------------------- pure-JAX reference -----------------------------

def ref_forward(x, p, heads, dim_head, eps=1e-5):
    b, n, dim = x.shape
    inner = heads * dim_head
    scale = dim_head ** -0.5

    qkv = x @ p["w_qkv"]
    q, k, v = jnp.split(qkv, 3, axis=-1)
    sh = lambda t: t.reshape(b, n, heads, dim_head).transpose(0, 2, 1, 3)
    q, k, v = sh(q), sh(k), sh(v)
    attn = jax.nn.softmax(jnp.einsum("bhid,bhjd->bhij", q, k) * scale, axis=-1)

    # reatten_matrix: 1x1 conv with bias over channels=heads
    y = jnp.einsum("oc,bcij->boij", p["w_re"], attn) + p["b_re"][None, :, None, None]
    # var_norm: BatchNorm2d, train-mode batch stats, biased variance
    m = y.mean(axis=(0, 2, 3), keepdims=True)
    va = y.var(axis=(0, 2, 3), keepdims=True)
    y = ((y - m) / jnp.sqrt(va + eps) * p["gamma"][None, :, None, None]
         + p["beta"][None, :, None, None])          # * reatten_scale (== 1.0)

    out = jnp.einsum("bhij,bhjd->bhid", y, v)
    out = out.transpose(0, 2, 1, 3).reshape(b, n, inner)
    return out @ p["w_out"] + p["b_out"]


# ----------------------------- params / main -----------------------------

def init_params(key, dim, heads, dim_head):
    inner = heads * dim_head
    ks = jax.random.split(key, 7)
    nrm = lambda k, shp, s: s * jax.random.normal(k, shp, jnp.float32)
    return dict(
        w_qkv=nrm(ks[0], (dim, 3 * inner), dim ** -0.5),
        w_re=nrm(ks[1], (heads, heads), heads ** -0.5),
        b_re=nrm(ks[2], (heads,), 0.1),
        gamma=1.0 + nrm(ks[3], (heads,), 0.1),
        beta=nrm(ks[4], (heads,), 0.1),
        w_out=nrm(ks[5], (inner, dim), inner ** -0.5),
        b_out=nrm(ks[6], (dim,), 0.02),
    )


if __name__ == "__main__":
    b, n, dim = 2, 16, 32
    heads, dim_head = 4, 8

    key = jax.random.PRNGKey(0)
    kp, kx = jax.random.split(key)
    params = init_params(kp, dim, heads, dim_head)
    x = jax.random.normal(kx, (b, n, dim), jnp.float32)

    fwd = jax.jit(functools.partial(reattention_forward, heads=heads, dim_head=dim_head))
    out = jax.block_until_ready(fwd(x, params))

    ref = np.asarray(ref_forward(x, params, heads, dim_head))
    # Tolerance sized for bf16 storage of the inter-kernel tensors: 2% relative plus
    # 2% of the output dynamic range.
    atol = max(2e-2, 2e-2 * float(np.abs(ref).max()))
    np.testing.assert_allclose(np.asarray(out), ref, rtol=2e-2, atol=atol)

    print("KERNEL_OK")
</pallas_src>

<mosaic_0001>
module attributes {stable_mosaic.version = 11 : i64} {
  func.func @kernel(%arg0: i32, %arg1: i32, %arg2: memref<1x4x16x16xbf16, #tpu.memory_space<vmem>>, %arg3: memref<1x16x32xbf16, #tpu.memory_space<vmem>>, %arg4: memref<4xf32, #tpu.memory_space<smem>>, %arg5: memref<4xf32, #tpu.memory_space<smem>>, %arg6: memref<32x32xf32, #tpu.memory_space<vmem>>, %arg7: memref<1x32xf32, #tpu.memory_space<vmem>>, %arg8: memref<1x16x32xf32, #tpu.memory_space<vmem>>) attributes {dimension_semantics = [#tpu.dimension_semantics<parallel>, #tpu.dimension_semantics<parallel>], iteration_bounds = array<i64: 2, 1>, scalar_prefetch = 0 : i64, scratch_operands = 0 : i64, tpu.core_type = #tpu.core_type<tc>, window_params = [{transform_indices = @transform_0, window_bounds = array<i64: 1, 4, 16, 16>}, {transform_indices = @transform_1, window_bounds = array<i64: 1, 16, 32>}, {transform_indices = @transform_2, window_bounds = array<i64: 4>}, {transform_indices = @transform_3, window_bounds = array<i64: 4>}, {pipeline_mode = #tpu.pipeline_mode<synchronous>, transform_indices = @transform_4, window_bounds = array<i64: 32, 32>}, {pipeline_mode = #tpu.pipeline_mode<synchronous>, transform_indices = @transform_5, window_bounds = array<i64: 1, 32>}, {transform_indices = @transform_6, window_bounds = array<i64: 1, 16, 32>}]} {
    %c0 = arith.constant 0 : index
    %c0_0 = arith.constant 0 : index
    %c0_1 = arith.constant 0 : index
    %0 = vector.load %arg3[%c0, %c0_0, %c0_1] : memref<1x16x32xbf16, #tpu.memory_space<vmem>>, vector<1x16x32xbf16>
    %1 = vector.shape_cast %0 : vector<1x16x32xbf16> to vector<16x32xbf16>
    %c0_2 = arith.constant 0 : index
    %c0_3 = arith.constant 0 : index
    %2 = vector.load %arg6[%c0_2, %c0_3] : memref<32x32xf32, #tpu.memory_space<vmem>>, vector<32x32xf32>
    %3 = arith.truncf %2 : vector<32x32xf32> to vector<32x32xbf16>
    %cst = arith.constant 0.000000e+00 : f32
    %4 = vector.broadcast %cst : f32 to vector<16x32xf32>
    %5 = vector.extract_strided_slice %1 {offsets = [0, 0], sizes = [16, 8], strides = [1, 1]} : vector<16x32xbf16> to vector<16x8xbf16>
    %6 = vector.extract_strided_slice %3 {offsets = [0, 0], sizes = [8, 32], strides = [1, 1]} : vector<32x32xbf16> to vector<8x32xbf16>
    %cst_4 = arith.constant dense<0.000000e+00> : vector<16x32xf32>
    %7 = tpu.matmul %5, %6, %cst_4 {dimension_numbers = #tpu.dot_dimension_numbers<[1], [0], [0], [1], [0, 0, 1, 1], [], []>} : vector<16x8xbf16>, vector<8x32xbf16>, vector<16x32xf32> -> vector<16x32xf32>
    %c0_5 = arith.constant 0 : index
    %c0_6 = arith.constant 0 : index
    %c0_7 = arith.constant 0 : index
    %c0_8 = arith.constant 0 : index
    %8 = vector.load %arg2[%c0_5, %c0_6, %c0_7, %c0_8] : memref<1x4x16x16xbf16, #tpu.memory_space<vmem>>, vector<1x1x16x16xbf16>
    %9 = vector.shape_cast %8 : vector<1x1x16x16xbf16> to vector<16x16xbf16>
    %10 = arith.extf %9 : vector<16x16xbf16> to vector<16x16xf32>
    %c0_9 = arith.constant 0 : index
    %11 = memref.load %arg4[%c0_9] : memref<4xf32, #tpu.memory_space<smem>>
    %12 = vector.broadcast %11 : f32 to vector<16x16xf32>
    %13 = arith.mulf %10, %12 : vector<16x16xf32>
    %c0_10 = arith.constant 0 : index
    %14 = memref.load %arg5[%c0_10] : memref<4xf32, #tpu.memory_space<smem>>
    %15 = vector.broadcast %14 : f32 to vector<16x16xf32>
    %16 = arith.addf %13, %15 : vector<16x16xf32>
    %cst_11 = arith.constant dense<0.000000e+00> : vector<16x32xf32>
    %17 = tpu.matmul %16, %7, %cst_11 {dimension_numbers = #tpu.dot_dimension_numbers<[1], [0], [0], [1], [0, 0, 1, 1], [], []>} : vector<16x16xf32>, vector<16x32xf32>, vector<16x32xf32> -> vector<16x32xf32>
    %18 = arith.addf %4, %17 : vector<16x32xf32>
    %19 = vector.extract_strided_slice %1 {offsets = [0, 8], sizes = [16, 8], strides = [1, 1]} : vector<16x32xbf16> to vector<16x8xbf16>
    %20 = vector.extract_strided_slice %3 {offsets = [8, 0], sizes = [8, 32], strides = [1, 1]} : vector<32x32xbf16> to vector<8x32xbf16>
    %cst_12 = arith.constant dense<0.000000e+00> : vector<16x32xf32>
    %21 = tpu.matmul %19, %20, %cst_12 {dimension_numbers = #tpu.dot_dimension_numbers<[1], [0], [0], [1], [0, 0, 1, 1], [], []>} : vector<16x8xbf16>, vector<8x32xbf16>, vector<16x32xf32> -> vector<16x32xf32>
    %c0_13 = arith.constant 0 : index
    %c1 = arith.constant 1 : index
    %c0_14 = arith.constant 0 : index
    %c0_15 = arith.constant 0 : index
    %22 = vector.load %arg2[%c0_13, %c1, %c0_14, %c0_15] : memref<1x4x16x16xbf16, #tpu.memory_space<vmem>>, vector<1x1x16x16xbf16>
    %23 = vector.shape_cast %22 : vector<1x1x16x16xbf16> to vector<16x16xbf16>
    %24 = arith.extf %23 : vector<16x16xbf16> to vector<16x16xf32>
    %c1_16 = arith.constant 1 : index
    %25 = memref.load %arg4[%c1_16] : memref<4xf32, #tpu.memory_space<smem>>
    %26 = vector.broadcast %25 : f32 to vector<16x16xf32>
    %27 = arith.mulf %24, %26 : vector<16x16xf32>
    %c1_17 = arith.constant 1 : index
    %28 = memref.load %arg5[%c1_17] : memref<4xf32, #tpu.memory_space<smem>>
    %29 = vector.broadcast %28 : f32 to vector<16x16xf32>
    %30 = arith.addf %27, %29 : vector<16x16xf32>
    %cst_18 = arith.constant dense<0.000000e+00> : vector<16x32xf32>
    %31 = tpu.matmul %30, %21, %cst_18 {dimension_numbers = #tpu.dot_dimension_numbers<[1], [0], [0], [1], [0, 0, 1, 1], [], []>} : vector<16x16xf32>, vector<16x32xf32>, vector<16x32xf32> -> vector<16x32xf32>
    %32 = arith.addf %18, %31 : vector<16x32xf32>
    %33 = vector.extract_strided_slice %1 {offsets = [0, 16], sizes = [16, 8], strides = [1, 1]} : vector<16x32xbf16> to vector<16x8xbf16>
    %34 = vector.extract_strided_slice %3 {offsets = [16, 0], sizes = [8, 32], strides = [1, 1]} : vector<32x32xbf16> to vector<8x32xbf16>
    %cst_19 = arith.constant dense<0.000000e+00> : vector<16x32xf32>
    %35 = tpu.matmul %33, %34, %cst_19 {dimension_numbers = #tpu.dot_dimension_numbers<[1], [0], [0], [1], [0, 0, 1, 1], [], []>} : vector<16x8xbf16>, vector<8x32xbf16>, vector<16x32xf32> -> vector<16x32xf32>
    %c0_20 = arith.constant 0 : index
    %c2 = arith.constant 2 : index
    %c0_21 = arith.constant 0 : index
    %c0_22 = arith.constant 0 : index
    %36 = vector.load %arg2[%c0_20, %c2, %c0_21, %c0_22] : memref<1x4x16x16xbf16, #tpu.memory_space<vmem>>, vector<1x1x16x16xbf16>
    %37 = vector.shape_cast %36 : vector<1x1x16x16xbf16> to vector<16x16xbf16>
    %38 = arith.extf %37 : vector<16x16xbf16> to vector<16x16xf32>
    %c2_23 = arith.constant 2 : index
    %39 = memref.load %arg4[%c2_23] : memref<4xf32, #tpu.memory_space<smem>>
    %40 = vector.broadcast %39 : f32 to vector<16x16xf32>
    %41 = arith.mulf %38, %40 : vector<16x16xf32>
    %c2_24 = arith.constant 2 : index
    %42 = memref.load %arg5[%c2_24] : memref<4xf32, #tpu.memory_space<smem>>
    %43 = vector.broadcast %42 : f32 to vector<16x16xf32>
    %44 = arith.addf %41, %43 : vector<16x16xf32>
    %cst_25 = arith.constant dense<0.000000e+00> : vector<16x32xf32>
    %45 = tpu.matmul %44, %35, %cst_25 {dimension_numbers = #tpu.dot_dimension_numbers<[1], [0], [0], [1], [0, 0, 1, 1], [], []>} : vector<16x16xf32>, vector<16x32xf32>, vector<16x32xf32> -> vector<16x32xf32>
    %46 = arith.addf %32, %45 : vector<16x32xf32>
    %47 = vector.extract_strided_slice %1 {offsets = [0, 24], sizes = [16, 8], strides = [1, 1]} : vector<16x32xbf16> to vector<16x8xbf16>
    %48 = vector.extract_strided_slice %3 {offsets = [24, 0], sizes = [8, 32], strides = [1, 1]} : vector<32x32xbf16> to vector<8x32xbf16>
    %cst_26 = arith.constant dense<0.000000e+00> : vector<16x32xf32>
    %49 = tpu.matmul %47, %48, %cst_26 {dimension_numbers = #tpu.dot_dimension_numbers<[1], [0], [0], [1], [0, 0, 1, 1], [], []>} : vector<16x8xbf16>, vector<8x32xbf16>, vector<16x32xf32> -> vector<16x32xf32>
    %c0_27 = arith.constant 0 : index
    %c3 = arith.constant 3 : index
    %c0_28 = arith.constant 0 : index
    %c0_29 = arith.constant 0 : index
    %50 = vector.load %arg2[%c0_27, %c3, %c0_28, %c0_29] : memref<1x4x16x16xbf16, #tpu.memory_space<vmem>>, vector<1x1x16x16xbf16>
    %51 = vector.shape_cast %50 : vector<1x1x16x16xbf16> to vector<16x16xbf16>
    %52 = arith.extf %51 : vector<16x16xbf16> to vector<16x16xf32>
    %c3_30 = arith.constant 3 : index
    %53 = memref.load %arg4[%c3_30] : memref<4xf32, #tpu.memory_space<smem>>
    %54 = vector.broadcast %53 : f32 to vector<16x16xf32>
    %55 = arith.mulf %52, %54 : vector<16x16xf32>
    %c3_31 = arith.constant 3 : index
    %56 = memref.load %arg5[%c3_31] : memref<4xf32, #tpu.memory_space<smem>>
    %57 = vector.broadcast %56 : f32 to vector<16x16xf32>
    %58 = arith.addf %55, %57 : vector<16x16xf32>
    %cst_32 = arith.constant dense<0.000000e+00> : vector<16x32xf32>
    %59 = tpu.matmul %58, %49, %cst_32 {dimension_numbers = #tpu.dot_dimension_numbers<[1], [0], [0], [1], [0, 0, 1, 1], [], []>} : vector<16x16xf32>, vector<16x32xf32>, vector<16x32xf32> -> vector<16x32xf32>
    %60 = arith.addf %46, %59 : vector<16x32xf32>
    %c0_33 = arith.constant 0 : index
    %c0_34 = arith.constant 0 : index
    %61 = vector.load %arg7[%c0_33, %c0_34] : memref<1x32xf32, #tpu.memory_space<vmem>>, vector<1x32xf32>
    %62 = vector.broadcast %61 : vector<1x32xf32> to vector<16x32xf32>
    %63 = arith.addf %60, %62 : vector<16x32xf32>
    %c0_35 = arith.constant 0 : index
    %c0_36 = arith.constant 0 : index
    %c0_37 = arith.constant 0 : index
    %64 = vector.load %arg8[%c0_35, %c0_36, %c0_37] : memref<1x16x32xf32, #tpu.memory_space<vmem>>, vector<1x16x32xf32>
    %65 = vector.shape_cast %64 : vector<1x16x32xf32> to vector<16x32xf32>
    %66 = vector.shape_cast %63 : vector<16x32xf32> to vector<1x16x32xf32>
    tpu.vector_store %arg8[%c0_35, %c0_36, %c0_37], %66 {strides = array<i32>} : memref<1x16x32xf32, #tpu.memory_space<vmem>>, vector<1x16x32xf32>,
    return
  }
  func.func @transform_0(%arg0: i32, %arg1: i32) -> (i32, i32, i32, i32) {
    %c0_i32 = arith.constant 0 : i32
    %c0_i32_0 = arith.constant 0 : i32
    %c0_i32_1 = arith.constant 0 : i32
    return %arg0, %c0_i32, %arg1, %c0_i32_0 : i32, i32, i32, i32
  }
  func.func @transform_1(%arg0: i32, %arg1: i32) -> (i32, i32, i32) {
    %c0_i32 = arith.constant 0 : i32
    %c0_i32_0 = arith.constant 0 : i32
    %c0_i32_1 = arith.constant 0 : i32
    return %arg0, %c0_i32, %c0_i32_0 : i32, i32, i32
  }
  func.func @transform_2(%arg0: i32, %arg1: i32) -> i32 {
    %c0_i32 = arith.constant 0 : i32
    %c0_i32_0 = arith.constant 0 : i32
    return %c0_i32 : i32
  }
  func.func @transform_3(%arg0: i32, %arg1: i32) -> i32 {
    %c0_i32 = arith.constant 0 : i32
    %c0_i32_0 = arith.constant 0 : i32
    return %c0_i32 : i32
  }
  func.func @transform_4(%arg0: i32, %arg1: i32) -> (i32, i32) {
    %c0_i32 = arith.constant 0 : i32
    %c0_i32_0 = arith.constant 0 : i32
    %c0_i32_1 = arith.constant 0 : i32
    return %c0_i32, %c0_i32_0 : i32, i32
  }
  func.func @transform_5(%arg0: i32, %arg1: i32) -> (i32, i32) {
    %c0_i32 = arith.constant 0 : i32
    %c0_i32_0 = arith.constant 0 : i32
    %c0_i32_1 = arith.constant 0 : i32
    return %c0_i32, %c0_i32_0 : i32, i32
  }
  func.func @transform_6(%arg0: i32, %arg1: i32) -> (i32, i32, i32) {
    %c0_i32 = arith.constant 0 : i32
    %c0_i32_0 = arith.constant 0 : i32
    return %arg0, %arg1, %c0_i32 : i32, i32, i32
  }
}

module attributes {stable_mosaic.version = 11 : i64} {
  func.func @kernel(%arg0: i32, %arg1: memref<1x16x32xf32, #tpu.memory_space<vmem>>, %arg2: memref<32x96xf32, #tpu.memory_space<vmem>>, %arg3: memref<4x4xf32, #tpu.memory_space<smem>>, %arg4: memref<4xf32, #tpu.memory_space<smem>>, %arg5: memref<1x4x16x16xbf16, #tpu.memory_space<vmem>>, %arg6: memref<1x16x32xbf16, #tpu.memory_space<vmem>>, %arg7: memref<1x2x4xf32, #tpu.memory_space<vmem>>, %arg8: memref<4x16x16xf32, #tpu.memory_space<vmem>>) attributes {dimension_semantics = [#tpu.dimension_semantics<parallel>], iteration_bounds = array<i64: 2>, scalar_prefetch = 0 : i64, scratch_operands = 1 : i64, tpu.core_type = #tpu.core_type<tc>, window_params = [{transform_indices = @transform_0, window_bounds = array<i64: 1, 16, 32>}, {pipeline_mode = #tpu.pipeline_mode<synchronous>, transform_indices = @transform_1, window_bounds = array<i64: 32, 96>}, {transform_indices = @transform_2, window_bounds = array<i64: 4, 4>}, {transform_indices = @transform_3, window_bounds = array<i64: 4>}, {transform_indices = @transform_4, window_bounds = array<i64: 1, 4, 16, 16>}, {transform_indices = @transform_5, window_bounds = array<i64: 1, 16, 32>}, {transform_indices = @transform_6, window_bounds = array<i64: 1, 2, 4>}]} {
    %c0 = arith.constant 0 : index
    %c0_0 = arith.constant 0 : index
    %c0_1 = arith.constant 0 : index
    %0 = vector.load %arg1[%c0, %c0_0, %c0_1] : memref<1x16x32xf32, #tpu.memory_space<vmem>>, vector<1x16x32xf32>
    %1 = vector.shape_cast %0 : vector<1x16x32xf32> to vector<16x32xf32>
    %c0_2 = arith.constant 0 : index
    %c0_3 = arith.constant 0 : index
    %2 = vector.load %arg2[%c0_2, %c0_3] : memref<32x96xf32, #tpu.memory_space<vmem>>, vector<32x96xf32>
    %cst = arith.constant dense<0.000000e+00> : vector<16x96xf32>
    %3 = tpu.matmul %1, %2, %cst {dimension_numbers = #tpu.dot_dimension_numbers<[1], [0], [0], [1], [0, 0, 1, 1], [], []>} : vector<16x32xf32>, vector<32x96xf32>, vector<16x96xf32> -> vector<16x96xf32>
    %4 = vector.extract_strided_slice %3 {offsets = [0, 64], sizes = [16, 32], strides = [1, 1]} : vector<16x96xf32> to vector<16x32xf32>
    %5 = arith.truncf %4 : vector<16x32xf32> to vector<16x32xbf16>
    %c0_4 = arith.constant 0 : index
    %c0_5 = arith.constant 0 : index
    %c0_6 = arith.constant 0 : index
    %6 = vector.load %arg6[%c0_4, %c0_5, %c0_6] : memref<1x16x32xbf16, #tpu.memory_space<vmem>>, vector<1x16x32xbf16>
    %7 = vector.shape_cast %6 : vector<1x16x32xbf16> to vector<16x32xbf16>
    %8 = vector.shape_cast %5 : vector<16x32xbf16> to vector<1x16x32xbf16>
    tpu.vector_store %arg6[%c0_4, %c0_5, %c0_6], %8 {strides = array<i32>} : memref<1x16x32xbf16, #tpu.memory_space<vmem>>, vector<1x16x32xbf16>,
    %9 = vector.extract_strided_slice %3 {offsets = [0, 0], sizes = [16, 8], strides = [1, 1]} : vector<16x96xf32> to vector<16x8xf32>
    %10 = vector.extract_strided_slice %3 {offsets = [0, 32], sizes = [16, 8], strides = [1, 1]} : vector<16x96xf32> to vector<16x8xf32>
    %cst_7 = arith.constant dense<0.000000e+00> : vector<16x16xf32>
    %11 = tpu.matmul %9, %10, %cst_7 {dimension_numbers = #tpu.dot_dimension_numbers<[1], [1], [0], [0], [0, 0, 1, 0], [], []>} : vector<16x8xf32>, vector<16x8xf32>, vector<16x16xf32> -> vector<16x16xf32>
    %cst_8 = arith.constant 0.353553385 : f32
    %12 = vector.broadcast %cst_8 : f32 to vector<16x16xf32>
    %13 = arith.mulf %11, %12 : vector<16x16xf32>
    %cst_9 = arith.constant dense<0xFF800000> : vector<16xf32>
    %14 = vector.multi_reduction <maximumf>, %13, %cst_9 [1] : vector<16x16xf32> to vector<16xf32>
    %15 = vector.shape_cast %14 : vector<16xf32> to vector<16x1xf32>
    %16 = vector.broadcast %15 : vector<16x1xf32> to vector<16x16xf32>
    %17 = arith.subf %13, %16 : vector<16x16xf32>
    %18 = math.exp %17 : vector<16x16xf32>
    %cst_10 = arith.constant dense<0.000000e+00> : vector<16xf32>
    %19 = vector.multi_reduction <add>, %18, %cst_10 [1] : vector<16x16xf32> to vector<16xf32>
    %20 = vector.shape_cast %19 : vector<16xf32> to vector<16x1xf32>
    %21 = tpu.reciprocal %20 {approx = true} : vector<16x1xf32> -> vector<16x1xf32>
    %22 = vector.broadcast %21 : vector<16x1xf32> to vector<16x16xf32>
    %23 = arith.mulf %18, %22 : vector<16x16xf32>
    %c0_11 = arith.constant 0 : index
    %c0_12 = arith.constant 0 : index
    %24 = memref.load %arg3[%c0_11, %c0_12] : memref<4x4xf32, #tpu.memory_space<smem>>
    %25 = vector.broadcast %24 : f32 to vector<16x16xf32>
    %26 = arith.mulf %23, %25 : vector<16x16xf32>
    %c0_13 = arith.constant 0 : index
    %27 = memref.load %arg4[%c0_13] : memref<4xf32, #tpu.memory_space<smem>>
    %28 = vector.broadcast %27 : f32 to vector<16x16xf32>
    %29 = arith.addf %26, %28 : vector<16x16xf32>
    %c0_14 = arith.constant 0 : index
    %c0_15 = arith.constant 0 : index
    %c0_16 = arith.constant 0 : index
    %30 = vector.load %arg8[%c0_14, %c0_15, %c0_16] : memref<4x16x16xf32, #tpu.memory_space<vmem>>, vector<1x16x16xf32>
    %31 = vector.shape_cast %30 : vector<1x16x16xf32> to vector<16x16xf32>
    %32 = vector.shape_cast %29 : vector<16x16xf32> to vector<1x16x16xf32>
    tpu.vector_store %arg8[%c0_14, %c0_15, %c0_16], %32 {strides = array<i32>} : memref<4x16x16xf32, #tpu.memory_space<vmem>>, vector<1x16x16xf32>,
    %c1 = arith.constant 1 : index
    %c0_17 = arith.constant 0 : index
    %33 = memref.load %arg3[%c1, %c0_17] : memref<4x4xf32, #tpu.memory_space<smem>>
    %34 = vector.broadcast %33 : f32 to vector<16x16xf32>
    %35 = arith.mulf %23, %34 : vector<16x16xf32>
    %c1_18 = arith.constant 1 : index
    %36 = memref.load %arg4[%c1_18] : memref<4xf32, #tpu.memory_space<smem>>
    %37 = vector.broadcast %36 : f32 to vector<16x16xf32>
    %38 = arith.addf %35, %37 : vector<16x16xf32>
    %c1_19 = arith.constant 1 : index
    %c0_20 = arith.constant 0 : index
    %c0_21 = arith.constant 0 : index
    %39 = vector.load %arg8[%c1_19, %c0_20, %c0_21] : memref<4x16x16xf32, #tpu.memory_space<vmem>>, vector<1x16x16xf32>
    %40 = vector.shape_cast %39 : vector<1x16x16xf32> to vector<16x16xf32>
    %41 = vector.shape_cast %38 : vector<16x16xf32> to vector<1x16x16xf32>
    tpu.vector_store %arg8[%c1_19, %c0_20, %c0_21], %41 {strides = array<i32>} : memref<4x16x16xf32, #tpu.memory_space<vmem>>, vector<1x16x16xf32>,
    %c2 = arith.constant 2 : index
    %c0_22 = arith.constant 0 : index
    %42 = memref.load %arg3[%c2, %c0_22] : memref<4x4xf32, #tpu.memory_space<smem>>
    %43 = vector.broadcast %42 : f32 to vector<16x16xf32>
    %44 = arith.mulf %23, %43 : vector<16x16xf32>
    %c2_23 = arith.constant 2 : index
    %45 = memref.load %arg4[%c2_23] : memref<4xf32, #tpu.memory_space<smem>>
    %46 = vector.broadcast %45 : f32 to vector<16x16xf32>
    %47 = arith.addf %44, %46 : vector<16x16xf32>
    %c2_24 = arith.constant 2 : index
    %c0_25 = arith.constant 0 : index
    %c0_26 = arith.constant 0 : index
    %48 = vector.load %arg8[%c2_24, %c0_25, %c0_26] : memref<4x16x16xf32, #tpu.memory_space<vmem>>, vector<1x16x16xf32>
    %49 = vector.shape_cast %48 : vector<1x16x16xf32> to vector<16x16xf32>
    %50 = vector.shape_cast %47 : vector<16x16xf32> to vector<1x16x16xf32>
    tpu.vector_store %arg8[%c2_24, %c0_25, %c0_26], %50 {strides = array<i32>} : memref<4x16x16xf32, #tpu.memory_space<vmem>>, vector<1x16x16xf32>,
    %c3 = arith.constant 3 : index
    %c0_27 = arith.constant 0 : index
    %51 = memref.load %arg3[%c3, %c0_27] : memref<4x4xf32, #tpu.memory_space<smem>>
    %52 = vector.broadcast %51 : f32 to vector<16x16xf32>
    %53 = arith.mulf %23, %52 : vector<16x16xf32>
    %c3_28 = arith.constant 3 : index
    %54 = memref.load %arg4[%c3_28] : memref<4xf32, #tpu.memory_space<smem>>
    %55 = vector.broadcast %54 : f32 to vector<16x16xf32>
    %56 = arith.addf %53, %55 : vector<16x16xf32>
    %c3_29 = arith.constant 3 : index
    %c0_30 = arith.constant 0 : index
    %c0_31 = arith.constant 0 : index
    %57 = vector.load %arg8[%c3_29, %c0_30, %c0_31] : memref<4x16x16xf32, #tpu.memory_space<vmem>>, vector<1x16x16xf32>
    %58 = vector.shape_cast %57 : vector<1x16x16xf32> to vector<16x16xf32>
    %59 = vector.shape_cast %56 : vector<16x16xf32> to vector<1x16x16xf32>
    tpu.vector_store %arg8[%c3_29, %c0_30, %c0_31], %59 {strides = array<i32>} : memref<4x16x16xf32, #tpu.memory_space<vmem>>, vector<1x16x16xf32>,
    %60 = vector.extract_strided_slice %3 {offsets = [0, 8], sizes = [16, 8], strides = [1, 1]} : vector<16x96xf32> to vector<16x8xf32>
    %61 = vector.extract_strided_slice %3 {offsets = [0, 40], sizes = [16, 8], strides = [1, 1]} : vector<16x96xf32> to vector<16x8xf32>
    %cst_32 = arith.constant dense<0.000000e+00> : vector<16x16xf32>
    %62 = tpu.matmul %60, %61, %cst_32 {dimension_numbers = #tpu.dot_dimension_numbers<[1], [1], [0], [0], [0, 0, 1, 0], [], []>} : vector<16x8xf32>, vector<16x8xf32>, vector<16x16xf32> -> vector<16x16xf32>
    %cst_33 = arith.constant 0.353553385 : f32
    %63 = vector.broadcast %cst_33 : f32 to vector<16x16xf32>
    %64 = arith.mulf %62, %63 : vector<16x16xf32>
    %cst_34 = arith.constant dense<0xFF800000> : vector<16xf32>
    %65 = vector.multi_reduction <maximumf>, %64, %cst_34 [1] : vector<16x16xf32> to vector<16xf32>
    %66 = vector.shape_cast %65 : vector<16xf32> to vector<16x1xf32>
    %67 = vector.broadcast %66 : vector<16x1xf32> to vector<16x16xf32>
    %68 = arith.subf %64, %67 : vector<16x16xf32>
    %69 = math.exp %68 : vector<16x16xf32>
    %cst_35 = arith.constant dense<0.000000e+00> : vector<16xf32>
    %70 = vector.multi_reduction <add>, %69, %cst_35 [1] : vector<16x16xf32> to vector<16xf32>
    %71 = vector.shape_cast %70 : vector<16xf32> to vector<16x1xf32>
    %72 = tpu.reciprocal %71 {approx = true} : vector<16x1xf32> -> vector<16x1xf32>
    %73 = vector.broadcast %72 : vector<16x1xf32> to vector<16x16xf32>
    %74 = arith.mulf %69, %73 : vector<16x16xf32>
    %c0_36 = arith.constant 0 : index
    %c1_37 = arith.constant 1 : index
    %75 = memref.load %arg3[%c0_36, %c1_37] : memref<4x4xf32, #tpu.memory_space<smem>>
    %c0_38 = arith.constant 0 : index
    %c0_39 = arith.constant 0 : index
    %c0_40 = arith.constant 0 : index
    %76 = vector.load %arg8[%c0_38, %c0_39, %c0_40] : memref<4x16x16xf32, #tpu.memory_space<vmem>>, vector<1x16x16xf32>
    %77 = vector.shape_cast %76 : vector<1x16x16xf32> to vector<16x16xf32>
    %78 = vector.broadcast %75 : f32 to vector<16x16xf32>
    %79 = arith.mulf %74, %78 : vector<16x16xf32>
    %80 = arith.addf %77, %79 : vector<16x16xf32>
    %c0_41 = arith.constant 0 : index
    %c0_42 = arith.constant 0 : index
    %c0_43 = arith.constant 0 : index
    %81 = vector.load %arg8[%c0_41, %c0_42, %c0_43] : memref<4x16x16xf32, #tpu.memory_space<vmem>>, vector<1x16x16xf32>
    %82 = vector.shape_cast %81 : vector<1x16x16xf32> to vector<16x16xf32>
    %83 = vector.shape_cast %80 : vector<16x16xf32> to vector<1x16x16xf32>
    tpu.vector_store %arg8[%c0_41, %c0_42, %c0_43], %83 {strides = array<i32>} : memref<4x16x16xf32, #tpu.memory_space<vmem>>, vector<1x16x16xf32>,
    %c1_44 = arith.constant 1 : index
    %c1_45 = arith.constant 1 : index
    %84 = memref.load %arg3[%c1_44, %c1_45] : memref<4x4xf32, #tpu.memory_space<smem>>
    %c1_46 = arith.constant 1 : index
    %c0_47 = arith.constant 0 : index
    %c0_48 = arith.constant 0 : index
    %85 = vector.load %arg8[%c1_46, %c0_47, %c0_48] : memref<4x16x16xf32, #tpu.memory_space<vmem>>, vector<1x16x16xf32>
    %86 = vector.shape_cast %85 : vector<1x16x16xf32> to vector<16x16xf32>
    %87 = vector.broadcast %84 : f32 to vector<16x16xf32>
    %88 = arith.mulf %74, %87 : vector<16x16xf32>
    %89 = arith.addf %86, %88 : vector<16x16xf32>
    %c1_49 = arith.constant 1 : index
    %c0_50 = arith.constant 0 : index
    %c0_51 = arith.constant 0 : index
    %90 = vector.load %arg8[%c1_49, %c0_50, %c0_51] : memref<4x16x16xf32, #tpu.memory_space<vmem>>, vector<1x16x16xf32>
    %91 = vector.shape_cast %90 : vector<1x16x16xf32> to vector<16x16xf32>
    %92 = vector.shape_cast %89 : vector<16x16xf32> to vector<1x16x16xf32>
    tpu.vector_store %arg8[%c1_49, %c0_50, %c0_51], %92 {strides = array<i32>} : memref<4x16x16xf32, #tpu.memory_space<vmem>>, vector<1x16x16xf32>,
    %c2_52 = arith.constant 2 : index
    %c1_53 = arith.constant 1 : index
    %93 = memref.load %arg3[%c2_52, %c1_53] : memref<4x4xf32, #tpu.memory_space<smem>>
    %c2_54 = arith.constant 2 : index
    %c0_55 = arith.constant 0 : index
    %c0_56 = arith.constant 0 : index
    %94 = vector.load %arg8[%c2_54, %c0_55, %c0_56] : memref<4x16x16xf32, #tpu.memory_space<vmem>>, vector<1x16x16xf32>
    %95 = vector.shape_cast %94 : vector<1x16x16xf32> to vector<16x16xf32>
    %96 = vector.broadcast %93 : f32 to vector<16x16xf32>
    %97 = arith.mulf %74, %96 : vector<16x16xf32>
    %98 = arith.addf %95, %97 : vector<16x16xf32>
    %c2_57 = arith.constant 2 : index
    %c0_58 = arith.constant 0 : index
    %c0_59 = arith.constant 0 : index
    %99 = vector.load %arg8[%c2_57, %c0_58, %c0_59] : memref<4x16x16xf32, #tpu.memory_space<vmem>>, vector<1x16x16xf32>
    %100 = vector.shape_cast %99 : vector<1x16x16xf32> to vector<16x16xf32>
    %101 = vector.shape_cast %98 : vector<16x16xf32> to vector<1x16x16xf32>
    tpu.vector_store %arg8[%c2_57, %c0_58, %c0_59], %101 {strides = array<i32>} : memref<4x16x16xf32, #tpu.memory_space<vmem>>, vector<1x16x16xf32>,
    %c3_60 = arith.constant 3 : index
    %c1_61 = arith.constant 1 : index
    %102 = memref.load %arg3[%c3_60, %c1_61] : memref<4x4xf32, #tpu.memory_space<smem>>
    %c3_62 = arith.constant 3 : index
    %c0_63 = arith.constant 0 : index
    %c0_64 = arith.constant 0 : index
    %103 = vector.load %arg8[%c3_62, %c0_63, %c0_64] : memref<4x16x16xf32, #tpu.memory_space<vmem>>, vector<1x16x16xf32>
    %104 = vector.shape_cast %103 : vector<1x16x16xf32> to vector<16x16xf32>
    %105 = vector.broadcast %102 : f32 to vector<16x16xf32>
    %106 = arith.mulf %74, %105 : vector<16x16xf32>
    %107 = arith.addf %104, %106 : vector<16x16xf32>
    %c3_65 = arith.constant 3 : index
    %c0_66 = arith.constant 0 : index
    %c0_67 = arith.constant 0 : index
    %108 = vector.load %arg8[%c3_65, %c0_66, %c0_67] : memref<4x16x16xf32, #tpu.memory_space<vmem>>, vector<1x16x16xf32>
    %109 = vector.shape_cast %108 : vector<1x16x16xf32> to vector<16x16xf32>
    %110 = vector.shape_cast %107 : vector<16x16xf32> to vector<1x16x16xf32>
    tpu.vector_store %arg8[%c3_65, %c0_66, %c0_67], %110 {strides = array<i32>} : memref<4x16x16xf32, #tpu.memory_space<vmem>>, vector<1x16x16xf32>,
    %111 = vector.extract_strided_slice %3 {offsets = [0, 16], sizes = [16, 8], strides = [1, 1]} : vector<16x96xf32> to vector<16x8xf32>
    %112 = vector.extract_strided_slice %3 {offsets = [0, 48], sizes = [16, 8], strides = [1, 1]} : vector<16x96xf32> to vector<16x8xf32>
    %cst_68 = arith.constant dense<0.000000e+00> : vector<16x16xf32>
    %113 = tpu.matmul %111, %112, %cst_68 {dimension_numbers = #tpu.dot_dimension_numbers<[1], [1], [0], [0], [0, 0, 1, 0], [], []>} : vector<16x8xf32>, vector<16x8xf32>, vector<16x16xf32> -> vector<16x16xf32>
    %cst_69 = arith.constant 0.353553385 : f32
    %114 = vector.broadcast %cst_69 : f32 to vector<16x16xf32>
    %115 = arith.mulf %113, %114 : vector<16x16xf32>
    %cst_70 = arith.constant dense<0xFF800000> : vector<16xf32>
    %116 = vector.multi_reduction <maximumf>, %115, %cst_70 [1] : vector<16x16xf32> to vector<16xf32>
    %117 = vector.shape_cast %116 : vector<16xf32> to vector<16x1xf32>
    %118 = vector.broadcast %117 : vector<16x1xf32> to vector<16x16xf32>
    %119 = arith.subf %115, %118 : vector<16x16xf32>
    %120 = math.exp %119 : vector<16x16xf32>
    %cst_71 = arith.constant dense<0.000000e+00> : vector<16xf32>
    %121 = vector.multi_reduction <add>, %120, %cst_71 [1] : vector<16x16xf32> to vector<16xf32>
    %122 = vector.shape_cast %121 : vector<16xf32> to vector<16x1xf32>
    %123 = tpu.reciprocal %122 {approx = true} : vector<16x1xf32> -> vector<16x1xf32>
    %124 = vector.broadcast %123 : vector<16x1xf32> to vector<16x16xf32>
    %125 = arith.mulf %120, %124 : vector<16x16xf32>
    %c0_72 = arith.constant 0 : index
    %c2_73 = arith.constant 2 : index
    %126 = memref.load %arg3[%c0_72, %c2_73] : memref<4x4xf32, #tpu.memory_space<smem>>
    %c0_74 = arith.constant 0 : index
    %c0_75 = arith.constant 0 : index
    %c0_76 = arith.constant 0 : index
    %127 = vector.load %arg8[%c0_74, %c0_75, %c0_76] : memref<4x16x16xf32, #tpu.memory_space<vmem>>, vector<1x16x16xf32>
    %128 = vector.shape_cast %127 : vector<1x16x16xf32> to vector<16x16xf32>
    %129 = vector.broadcast %126 : f32 to vector<16x16xf32>
    %130 = arith.mulf %125, %129 : vector<16x16xf32>
    %131 = arith.addf %128, %130 : vector<16x16xf32>
    %c0_77 = arith.constant 0 : index
    %c0_78 = arith.constant 0 : index
    %c0_79 = arith.constant 0 : index
    %132 = vector.load %arg8[%c0_77, %c0_78, %c0_79] : memref<4x16x16xf32, #tpu.memory_space<vmem>>, vector<1x16x16xf32>
    %133 = vector.shape_cast %132 : vector<1x16x16xf32> to vector<16x16xf32>
    %134 = vector.shape_cast %131 : vector<16x16xf32> to vector<1x16x16xf32>
    tpu.vector_store %arg8[%c0_77, %c0_78, %c0_79], %134 {strides = array<i32>} : memref<4x16x16xf32, #tpu.memory_space<vmem>>, vector<1x16x16xf32>,
    %c1_80 = arith.constant 1 : index
    %c2_81 = arith.constant 2 : index
    %135 = memref.load %arg3[%c1_80, %c2_81] : memref<4x4xf32, #tpu.memory_space<smem>>
    %c1_82 = arith.constant 1 : index
    %c0_83 = arith.constant 0 : index
    %c0_84 = arith.constant 0 : index
    %136 = vector.load %arg8[%c1_82, %c0_83, %c0_84] : memref<4x16x16xf32, #tpu.memory_space<vmem>>, vector<1x16x16xf32>
    %137 = vector.shape_cast %136 : vector<1x16x16xf32> to vector<16x16xf32>
    %138 = vector.broadcast %135 : f32 to vector<16x16xf32>
    %139 = arith.mulf %125, %138 : vector<16x16xf32>
    %140 = arith.addf %137, %139 : vector<16x16xf32>
    %c1_85 = arith.constant 1 : index
    %c0_86 = arith.constant 0 : index
    %c0_87 = arith.constant 0 : index
    %141 = vector.load %arg8[%c1_85, %c0_86, %c0_87] : memref<4x16x16xf32, #tpu.memory_space<vmem>>, vector<1x16x16xf32>
    %142 = vector.shape_cast %141 : vector<1x16x16xf32> to vector<16x16xf32>
    %143 = vector.shape_cast %140 : vector<16x16xf32> to vector<1x16x16xf32>
    tpu.vector_store %arg8[%c1_85, %c0_86, %c0_87], %143 {strides = array<i32>} : memref<4x16x16xf32, #tpu.memory_space<vmem>>, vector<1x16x16xf32>,
    %c2_88 = arith.constant 2 : index
    %c2_89 = arith.constant 2 : index
    %144 = memref.load %arg3[%c2_88, %c2_89] : memref<4x4xf32, #tpu.memory_space<smem>>
    %c2_90 = arith.constant 2 : index
    %c0_91 = arith.constant 0 : index
    %c0_92 = arith.constant 0 : index
    %145 = vector.load %arg8[%c2_90, %c0_91, %c0_92] : memref<4x16x16xf32, #tpu.memory_space<vmem>>, vector<1x16x16xf32>
    %146 = vector.shape_cast %145 : vector<1x16x16xf32> to vector<16x16xf32>
    %147 = vector.broadcast %144 : f32 to vector<16x16xf32>
    %148 = arith.mulf %125, %147 : vector<16x16xf32>
    %149 = arith.addf %146, %148 : vector<16x16xf32>
    %c2_93 = arith.constant 2 : index
    %c0_94 = arith.constant 0 : index
    %c0_95 = arith.constant 0 : index
    %150 = vector.load %arg8[%c2_93, %c0_94, %c0_95] : memref<4x16x16xf32, #tpu.memory_space<vmem>>, vector<1x16x16xf32>
    %151 = vector.shape_cast %150 : vector<1x16x16xf32> to vector<16x16xf32>
    %152 = vector.shape_cast %149 : vector<16x16xf32> to vector<1x16x16xf32>
    tpu.vector_store %arg8[%c2_93, %c0_94, %c0_95], %152 {strides = array<i32>} : memref<4x16x16xf32, #tpu.memory_space<vmem>>, vector<1x16x16xf32>,
    %c3_96 = arith.constant 3 : index
    %c2_97 = arith.constant 2 : index
    %153 = memref.load %arg3[%c3_96, %c2_97] : memref<4x4xf32, #tpu.memory_space<smem>>
    %c3_98 = arith.constant 3 : index
    %c0_99 = arith.constant 0 : index
    %c0_100 = arith.constant 0 : index
    %154 = vector.load %arg8[%c3_98, %c0_99, %c0_100] : memref<4x16x16xf32, #tpu.memory_space<vmem>>, vector<1x16x16xf32>
    %155 = vector.shape_cast %154 : vector<1x16x16xf32> to vector<16x16xf32>
    %156 = vector.broadcast %153 : f32 to vector<16x16xf32>
    %157 = arith.mulf %125, %156 : vector<16x16xf32>
    %158 = arith.addf %155, %157 : vector<16x16xf32>
    %c3_101 = arith.constant 3 : index
    %c0_102 = arith.constant 0 : index
    %c0_103 = arith.constant 0 : index
    %159 = vector.load %arg8[%c3_101, %c0_102, %c0_103] : memref<4x16x16xf32, #tpu.memory_space<vmem>>, vector<1x16x16xf32>
    %160 = vector.shape_cast %159 : vector<1x16x16xf32> to vector<16x16xf32>
    %161 = vector.shape_cast %158 : vector<16x16xf32> to vector<1x16x16xf32>
    tpu.vector_store %arg8[%c3_101, %c0_102, %c0_103], %161 {strides = array<i32>} : memref<4x16x16xf32, #tpu.memory_space<vmem>>, vector<1x16x16xf32>,
    %162 = vector.extract_strided_slice %3 {offsets = [0, 24], sizes = [16, 8], strides = [1, 1]} : vector<16x96xf32> to vector<16x8xf32>
    %163 = vector.extract_strided_slice %3 {offsets = [0, 56], sizes = [16, 8], strides = [1, 1]} : vector<16x96xf32> to vector<16x8xf32>
    %cst_104 = arith.constant dense<0.000000e+00> : vector<16x16xf32>
    %164 = tpu.matmul %162, %163, %cst_104 {dimension_numbers = #tpu.dot_dimension_numbers<[1], [1], [0], [0], [0, 0, 1, 0], [], []>} : vector<16x8xf32>, vector<16x8xf32>, vector<16x16xf32> -> vector<16x16xf32>
    %cst_105 = arith.constant 0.353553385 : f32
    %165 = vector.broadcast %cst_105 : f32 to vector<16x16xf32>
    %166 = arith.mulf %164, %165 : vector<16x16xf32>
    %cst_106 = arith.constant dense<0xFF800000> : vector<16xf32>
    %167 = vector.multi_reduction <maximumf>, %166, %cst_106 [1] : vector<16x16xf32> to vector<16xf32>
    %168 = vector.shape_cast %167 : vector<16xf32> to vector<16x1xf32>
    %169 = vector.broadcast %168 : vector<16x1xf32> to vector<16x16xf32>
    %170 = arith.subf %166, %169 : vector<16x16xf32>
    %171 = math.exp %170 : vector<16x16xf32>
    %cst_107 = arith.constant dense<0.000000e+00> : vector<16xf32>
    %172 = vector.multi_reduction <add>, %171, %cst_107 [1] : vector<16x16xf32> to vector<16xf32>
    %173 = vector.shape_cast %172 : vector<16xf32> to vector<16x1xf32>
    %174 = tpu.reciprocal %173 {approx = true} : vector<16x1xf32> -> vector<16x1xf32>
    %175 = vector.broadcast %174 : vector<16x1xf32> to vector<16x16xf32>
    %176 = arith.mulf %171, %175 : vector<16x16xf32>
    %c0_108 = arith.constant 0 : index
    %c3_109 = arith.constant 3 : index
    %177 = memref.load %arg3[%c0_108, %c3_109] : memref<4x4xf32, #tpu.memory_space<smem>>
    %c0_110 = arith.constant 0 : index
    %c0_111 = arith.constant 0 : index
    %c0_112 = arith.constant 0 : index
    %178 = vector.load %arg8[%c0_110, %c0_111, %c0_112] : memref<4x16x16xf32, #tpu.memory_space<vmem>>, vector<1x16x16xf32>
    %179 = vector.shape_cast %178 : vector<1x16x16xf32> to vector<16x16xf32>
    %180 = vector.broadcast %177 : f32 to vector<16x16xf32>
    %181 = arith.mulf %176, %180 : vector<16x16xf32>
    %182 = arith.addf %179, %181 : vector<16x16xf32>
    %c0_113 = arith.constant 0 : index
    %c0_114 = arith.constant 0 : index
    %c0_115 = arith.constant 0 : index
    %183 = vector.load %arg8[%c0_113, %c0_114, %c0_115] : memref<4x16x16xf32, #tpu.memory_space<vmem>>, vector<1x16x16xf32>
    %184 = vector.shape_cast %183 : vector<1x16x16xf32> to vector<16x16xf32>
    %185 = vector.shape_cast %182 : vector<16x16xf32> to vector<1x16x16xf32>
    tpu.vector_store %arg8[%c0_113, %c0_114, %c0_115], %185 {strides = array<i32>} : memref<4x16x16xf32, #tpu.memory_space<vmem>>, vector<1x16x16xf32>,
    %c1_116 = arith.constant 1 : index
    %c3_117 = arith.constant 3 : index
    %186 = memref.load %arg3[%c1_116, %c3_117] : memref<4x4xf32, #tpu.memory_space<smem>>
    %c1_118 = arith.constant 1 : index
    %c0_119 = arith.constant 0 : index
    %c0_120 = arith.constant 0 : index
    %187 = vector.load %arg8[%c1_118, %c0_119, %c0_120] : memref<4x16x16xf32, #tpu.memory_space<vmem>>, vector<1x16x16xf32>
    %188 = vector.shape_cast %187 : vector<1x16x16xf32> to vector<16x16xf32>
    %189 = vector.broadcast %186 : f32 to vector<16x16xf32>
    %190 = arith.mulf %176, %189 : vector<16x16xf32>
    %191 = arith.addf %188, %190 : vector<16x16xf32>
    %c1_121 = arith.constant 1 : index
    %c0_122 = arith.constant 0 : index
    %c0_123 = arith.constant 0 : index
    %192 = vector.load %arg8[%c1_121, %c0_122, %c0_123] : memref<4x16x16xf32, #tpu.memory_space<vmem>>, vector<1x16x16xf32>
    %193 = vector.shape_cast %192 : vector<1x16x16xf32> to vector<16x16xf32>
    %194 = vector.shape_cast %191 : vector<16x16xf32> to vector<1x16x16xf32>
    tpu.vector_store %arg8[%c1_121, %c0_122, %c0_123], %194 {strides = array<i32>} : memref<4x16x16xf32, #tpu.memory_space<vmem>>, vector<1x16x16xf32>,
    %c2_124 = arith.constant 2 : index
    %c3_125 = arith.constant 3 : index
    %195 = memref.load %arg3[%c2_124, %c3_125] : memref<4x4xf32, #tpu.memory_space<smem>>
    %c2_126 = arith.constant 2 : index
    %c0_127 = arith.constant 0 : index
    %c0_128 = arith.constant 0 : index
    %196 = vector.load %arg8[%c2_126, %c0_127, %c0_128] : memref<4x16x16xf32, #tpu.memory_space<vmem>>, vector<1x16x16xf32>
    %197 = vector.shape_cast %196 : vector<1x16x16xf32> to vector<16x16xf32>
    %198 = vector.broadcast %195 : f32 to vector<16x16xf32>
    %199 = arith.mulf %176, %198 : vector<16x16xf32>
    %200 = arith.addf %197, %199 : vector<16x16xf32>
    %c2_129 = arith.constant 2 : index
    %c0_130 = arith.constant 0 : index
    %c0_131 = arith.constant 0 : index
    %201 = vector.load %arg8[%c2_129, %c0_130, %c0_131] : memref<4x16x16xf32, #tpu.memory_space<vmem>>, vector<1x16x16xf32>
    %202 = vector.shape_cast %201 : vector<1x16x16xf32> to vector<16x16xf32>
    %203 = vector.shape_cast %200 : vector<16x16xf32> to vector<1x16x16xf32>
    tpu.vector_store %arg8[%c2_129, %c0_130, %c0_131], %203 {strides = array<i32>} : memref<4x16x16xf32, #tpu.memory_space<vmem>>, vector<1x16x16xf32>,
    %c3_132 = arith.constant 3 : index
    %c3_133 = arith.constant 3 : index
    %204 = memref.load %arg3[%c3_132, %c3_133] : memref<4x4xf32, #tpu.memory_space<smem>>
    %c3_134 = arith.constant 3 : index
    %c0_135 = arith.constant 0 : index
    %c0_136 = arith.constant 0 : index
    %205 = vector.load %arg8[%c3_134, %c0_135, %c0_136] : memref<4x16x16xf32, #tpu.memory_space<vmem>>, vector<1x16x16xf32>
    %206 = vector.shape_cast %205 : vector<1x16x16xf32> to vector<16x16xf32>
    %207 = vector.broadcast %204 : f32 to vector<16x16xf32>
    %208 = arith.mulf %176, %207 : vector<16x16xf32>
    %209 = arith.addf %206, %208 : vector<16x16xf32>
    %c3_137 = arith.constant 3 : index
    %c0_138 = arith.constant 0 : index
    %c0_139 = arith.constant 0 : index
    %210 = vector.load %arg8[%c3_137, %c0_138, %c0_139] : memref<4x16x16xf32, #tpu.memory_space<vmem>>, vector<1x16x16xf32>
    %211 = vector.shape_cast %210 : vector<1x16x16xf32> to vector<16x16xf32>
    %212 = vector.shape_cast %209 : vector<16x16xf32> to vector<1x16x16xf32>
    tpu.vector_store %arg8[%c3_137, %c0_138, %c0_139], %212 {strides = array<i32>} : memref<4x16x16xf32, #tpu.memory_space<vmem>>, vector<1x16x16xf32>,
    %c0_140 = arith.constant 0 : index
    %c0_141 = arith.constant 0 : index
    %c0_142 = arith.constant 0 : index
    %213 = vector.load %arg8[%c0_140, %c0_141, %c0_142] : memref<4x16x16xf32, #tpu.memory_space<vmem>>, vector<1x16x16xf32>
    %214 = vector.shape_cast %213 : vector<1x16x16xf32> to vector<16x16xf32>
    %215 = arith.truncf %214 : vector<16x16xf32> to vector<16x16xbf16>
    %c0_143 = arith.constant 0 : index
    %c0_144 = arith.constant 0 : index
    %c0_145 = arith.constant 0 : index
    %c0_146 = arith.constant 0 : index
    %216 = vector.load %arg5[%c0_143, %c0_144, %c0_145, %c0_146] : memref<1x4x16x16xbf16, #tpu.memory_space<vmem>>, vector<1x1x16x16xbf16>
    %217 = vector.shape_cast %216 : vector<1x1x16x16xbf16> to vector<16x16xbf16>
    %218 = vector.shape_cast %215 : vector<16x16xbf16> to vector<1x1x16x16xbf16>
    tpu.vector_store %arg5[%c0_143, %c0_144, %c0_145, %c0_146], %218 {strides = array<i32>} : memref<1x4x16x16xbf16, #tpu.memory_space<vmem>>, vector<1x1x16x16xbf16>,
    %cst_147 = arith.constant dense<0.000000e+00> : vector<16xf32>
    %219 = vector.multi_reduction <add>, %214, %cst_147 [1] : vector<16x16xf32> to vector<16xf32>
    %220 = vector.shape_cast %219 : vector<16xf32> to vector<16x1xf32>
    %cst_148 = arith.constant dense<0.000000e+00> : vector<1xf32>
    %221 = vector.multi_reduction <add>, %220, %cst_148 [0] : vector<16x1xf32> to vector<1xf32>
    %222 = vector.shape_cast %221 : vector<1xf32> to vector<1x1xf32>
    %223 = arith.mulf %214, %214 : vector<16x16xf32>
    %cst_149 = arith.constant dense<0.000000e+00> : vector<16xf32>
    %224 = vector.multi_reduction <add>, %223, %cst_149 [1] : vector<16x16xf32> to vector<16xf32>
    %225 = vector.shape_cast %224 : vector<16xf32> to vector<16x1xf32>
    %cst_150 = arith.constant dense<0.000000e+00> : vector<1xf32>
    %226 = vector.multi_reduction <add>, %225, %cst_150 [0] : vector<16x1xf32> to vector<1xf32>
    %227 = vector.shape_cast %226 : vector<1xf32> to vector<1x1xf32>
    %c1_151 = arith.constant 1 : index
    %c0_152 = arith.constant 0 : index
    %c0_153 = arith.constant 0 : index
    %228 = vector.load %arg8[%c1_151, %c0_152, %c0_153] : memref<4x16x16xf32, #tpu.memory_space<vmem>>, vector<1x16x16xf32>
    %229 = vector.shape_cast %228 : vector<1x16x16xf32> to vector<16x16xf32>
    %230 = arith.truncf %229 : vector<16x16xf32> to vector<16x16xbf16>
    %c0_154 = arith.constant 0 : index
    %c1_155 = arith.constant 1 : index
    %c0_156 = arith.constant 0 : index
    %c0_157 = arith.constant 0 : index
    %231 = vector.load %arg5[%c0_154, %c1_155, %c0_156, %c0_157] : memref<1x4x16x16xbf16, #tpu.memory_space<vmem>>, vector<1x1x16x16xbf16>
    %232 = vector.shape_cast %231 : vector<1x1x16x16xbf16> to vector<16x16xbf16>
    %233 = vector.shape_cast %230 : vector<16x16xbf16> to vector<1x1x16x16xbf16>
    tpu.vector_store %arg5[%c0_154, %c1_155, %c0_156, %c0_157], %233 {strides = array<i32>} : memref<1x4x16x16xbf16, #tpu.memory_space<vmem>>, vector<1x1x16x16xbf16>,
    %cst_158 = arith.constant dense<0.000000e+00> : vector<16xf32>
    %234 = vector.multi_reduction <add>, %229, %cst_158 [1] : vector<16x16xf32> to vector<16xf32>
    %235 = vector.shape_cast %234 : vector<16xf32> to vector<16x1xf32>
    %cst_159 = arith.constant dense<0.000000e+00> : vector<1xf32>
    %236 = vector.multi_reduction <add>, %235, %cst_159 [0] : vector<16x1xf32> to vector<1xf32>
    %237 = vector.shape_cast %236 : vector<1xf32> to vector<1x1xf32>
    %238 = arith.mulf %229, %229 : vector<16x16xf32>
    %cst_160 = arith.constant dense<0.000000e+00> : vector<16xf32>
    %239 = vector.multi_reduction <add>, %238, %cst_160 [1] : vector<16x16xf32> to vector<16xf32>
    %240 = vector.shape_cast %239 : vector<16xf32> to vector<16x1xf32>
    %cst_161 = arith.constant dense<0.000000e+00> : vector<1xf32>
    %241 = vector.multi_reduction <add>, %240, %cst_161 [0] : vector<16x1xf32> to vector<1xf32>
    %242 = vector.shape_cast %241 : vector<1xf32> to vector<1x1xf32>
    %c2_162 = arith.constant 2 : index
    %c0_163 = arith.constant 0 : index
    %c0_164 = arith.constant 0 : index
    %243 = vector.load %arg8[%c2_162, %c0_163, %c0_164] : memref<4x16x16xf32, #tpu.memory_space<vmem>>, vector<1x16x16xf32>
    %244 = vector.shape_cast %243 : vector<1x16x16xf32> to vector<16x16xf32>
    %245 = arith.truncf %244 : vector<16x16xf32> to vector<16x16xbf16>
    %c0_165 = arith.constant 0 : index
    %c2_166 = arith.constant 2 : index
    %c0_167 = arith.constant 0 : index
    %c0_168 = arith.constant 0 : index
    %246 = vector.load %arg5[%c0_165, %c2_166, %c0_167, %c0_168] : memref<1x4x16x16xbf16, #tpu.memory_space<vmem>>, vector<1x1x16x16xbf16>
    %247 = vector.shape_cast %246 : vector<1x1x16x16xbf16> to vector<16x16xbf16>
    %248 = vector.shape_cast %245 : vector<16x16xbf16> to vector<1x1x16x16xbf16>
    tpu.vector_store %arg5[%c0_165, %c2_166, %c0_167, %c0_168], %248 {strides = array<i32>} : memref<1x4x16x16xbf16, #tpu.memory_space<vmem>>, vector<1x1x16x16xbf16>,
    %cst_169 = arith.constant dense<0.000000e+00> : vector<16xf32>
    %249 = vector.multi_reduction <add>, %244, %cst_169 [1] : vector<16x16xf32> to vector<16xf32>
    %250 = vector.shape_cast %249 : vector<16xf32> to vector<16x1xf32>
    %cst_170 = arith.constant dense<0.000000e+00> : vector<1xf32>
    %251 = vector.multi_reduction <add>, %250, %cst_170 [0] : vector<16x1xf32> to vector<1xf32>
    %252 = vector.shape_cast %251 : vector<1xf32> to vector<1x1xf32>
    %253 = arith.mulf %244, %244 : vector<16x16xf32>
    %cst_171 = arith.constant dense<0.000000e+00> : vector<16xf32>
    %254 = vector.multi_reduction <add>, %253, %cst_171 [1] : vector<16x16xf32> to vector<16xf32>
    %255 = vector.shape_cast %254 : vector<16xf32> to vector<16x1xf32>
    %cst_172 = arith.constant dense<0.000000e+00> : vector<1xf32>
    %256 = vector.multi_reduction <add>, %255, %cst_172 [0] : vector<16x1xf32> to vector<1xf32>
    %257 = vector.shape_cast %256 : vector<1xf32> to vector<1x1xf32>
    %c3_173 = arith.constant 3 : index
    %c0_174 = arith.constant 0 : index
    %c0_175 = arith.constant 0 : index
    %258 = vector.load %arg8[%c3_173, %c0_174, %c0_175] : memref<4x16x16xf32, #tpu.memory_space<vmem>>, vector<1x16x16xf32>
    %259 = vector.shape_cast %258 : vector<1x16x16xf32> to vector<16x16xf32>
    %260 = arith.truncf %259 : vector<16x16xf32> to vector<16x16xbf16>
    %c0_176 = arith.constant 0 : index
    %c3_177 = arith.constant 3 : index
    %c0_178 = arith.constant 0 : index
    %c0_179 = arith.constant 0 : index
    %261 = vector.load %arg5[%c0_176, %c3_177, %c0_178, %c0_179] : memref<1x4x16x16xbf16, #tpu.memory_space<vmem>>, vector<1x1x16x16xbf16>
    %262 = vector.shape_cast %261 : vector<1x1x16x16xbf16> to vector<16x16xbf16>
    %263 = vector.shape_cast %260 : vector<16x16xbf16> to vector<1x1x16x16xbf16>
    tpu.vector_store %arg5[%c0_176, %c3_177, %c0_178, %c0_179], %263 {strides = array<i32>} : memref<1x4x16x16xbf16, #tpu.memory_space<vmem>>, vector<1x1x16x16xbf16>,
    %cst_180 = arith.constant dense<0.000000e+00> : vector<16xf32>
    %264 = vector.multi_reduction <add>, %259, %cst_180 [1] : vector<16x16xf32> to vector<16xf32>
    %265 = vector.shape_cast %264 : vector<16xf32> to vector<16x1xf32>
    %cst_181 = arith.constant dense<0.000000e+00> : vector<1xf32>
    %266 = vector.multi_reduction <add>, %265, %cst_181 [0] : vector<16x1xf32> to vector<1xf32>
    %267 = vector.shape_cast %266 : vector<1xf32> to vector<1x1xf32>
    %268 = arith.mulf %259, %259 : vector<16x16xf32>
    %cst_182 = arith.constant dense<0.000000e+00> : vector<16xf32>
    %269 = vector.multi_reduction <add>, %268, %cst_182 [1] : vector<16x16xf32> to vector<16xf32>
    %270 = vector.shape_cast %269 : vector<16xf32> to vector<16x1xf32>
    %cst_183 = arith.constant dense<0.000000e+00> : vector<1xf32>
    %271 = vector.multi_reduction <add>, %270, %cst_183 [0] : vector<16x1xf32> to vector<1xf32>
    %272 = vector.shape_cast %271 : vector<1xf32> to vector<1x1xf32>
    %273 = tpu.concatenate %222, %237, %252, %267 in 1 : vector<1x1xf32>, vector<1x1xf32>, vector<1x1xf32>, vector<1x1xf32> -> vector<1x4xf32>
    %274 = tpu.concatenate %227, %242, %257, %272 in 1 : vector<1x1xf32>, vector<1x1xf32>, vector<1x1xf32>, vector<1x1xf32> -> vector<1x4xf32>
    %275 = tpu.concatenate %273, %274 in 0 : vector<1x4xf32>, vector<1x4xf32> -> vector<2x4xf32>
    %c0_184 = arith.constant 0 : index
    %c0_185 = arith.constant 0 : index
    %c0_186 = arith.constant 0 : index
    %276 = vector.load %arg7[%c0_184, %c0_185, %c0_186] : memref<1x2x4xf32, #tpu.memory_space<vmem>>, vector<1x2x4xf32>
    %277 = vector.shape_cast %276 : vector<1x2x4xf32> to vector<2x4xf32>
    %278 = vector.shape_cast %275 : vector<2x4xf32> to vector<1x2x4xf32>
    tpu.vector_store %arg7[%c0_184, %c0_185, %c0_186], %278 {strides = array<i32>} : memref<1x2x4xf32, #tpu.memory_space<vmem>>, vector<1x2x4xf32>,
    return
  }
  func.func @transform_0(%arg0: i32) -> (i32, i32, i32) {
    %c0_i32 = arith.constant 0 : i32
    %c0_i32_0 = arith.constant 0 : i32
    %c0_i32_1 = arith.constant 0 : i32
    return %arg0, %c0_i32, %c0_i32_0 : i32, i32, i32
  }
  func.func @transform_1(%arg0: i32) -> (i32, i32) {
    %c0_i32 = arith.constant 0 : i32
    %c0_i32_0 = arith.constant 0 : i32
    %c0_i32_1 = arith.constant 0 : i32
    return %c0_i32, %c0_i32_0 : i32, i32
  }
  func.func @transform_2(%arg0: i32) -> (i32, i32) {
    %c0_i32 = arith.constant 0 : i32
    %c0_i32_0 = arith.constant 0 : i32
    %c0_i32_1 = arith.constant 0 : i32
    return %c0_i32, %c0_i32_0 : i32, i32
  }
  func.func @transform_3(%arg0: i32) -> i32 {
    %c0_i32 = arith.constant 0 : i32
    %c0_i32_0 = arith.constant 0 : i32
    return %c0_i32 : i32
  }
  func.func @transform_4(%arg0: i32) -> (i32, i32, i32, i32) {
    %c0_i32 = arith.constant 0 : i32
    %c0_i32_0 = arith.constant 0 : i32
    %c0_i32_1 = arith.constant 0 : i32
    %c0_i32_2 = arith.constant 0 : i32
    return %arg0, %c0_i32, %c0_i32_0, %c0_i32_1 : i32, i32, i32, i32
  }
  func.func @transform_5(%arg0: i32) -> (i32, i32, i32) {
    %c0_i32 = arith.constant 0 : i32
    %c0_i32_0 = arith.constant 0 : i32
    %c0_i32_1 = arith.constant 0 : i32
    return %arg0, %c0_i32, %c0_i32_0 : i32, i32, i32
  }
  func.func @transform_6(%arg0: i32) -> (i32, i32, i32) {
    %c0_i32 = arith.constant 0 : i32
    %c0_i32_0 = arith.constant 0 : i32
    %c0_i32_1 = arith.constant 0 : i32
    return %arg0, %c0_i32, %c0_i32_0 : i32, i32, i32
  }
}

</mosaic_0001>

<bundles_post_ra>
// kernel: reattention_forward.3
= control target key start
LH: loop header
LB: loop body
LE: loop exit
PB: predicated region body
PF: predicated region fallthrough
CT: control target
= control target key end

     0   :  { %11 = vsyncpa [#allocation4], 0  ;;  %s1688_s0 = inlined_call_operand.vmem [shape: bf16[2,4,16,16], index: 0, kind: input, shape index: {}]   ;;  %s1689_s1 = inlined_call_operand.vmem [shape: bf16[2,16,32], index: 1, kind: input, shape index: {}]   ;;  %s1690_s2 = inlined_call_operand.vmem [shape: f32[4], index: 2, kind: input, shape index: {}]   ;;  %s1691_s3 = inlined_call_operand.vmem [shape: f32[4], index: 3, kind: input, shape index: {}]   ;;  %s1692_s4 = inlined_call_operand.vmem [shape: f32[32,32], index: 4, kind: input, shape index: {}]   ;;  %s1693_s5 = inlined_call_operand.vmem [shape: f32[1,32], index: 5, kind: input, shape index: {}]   ;;  %s1694_s6 = inlined_call_operand.hbm [shape: f32[2,16,32], index: 6, kind: output, shape index: {}]  }
   0x1   :  { %12 = vsyncpa [#allocation6], 0 }
   0x2   :  { %13 = vsyncpa [#allocation3], 0 }
   0x3   :  { %15 = vsyncpa [#allocation3 + $0x1], 0  ;;  %s1475_s21 = smov 0   ;;  %s1477_s22 = smov 0  }
   0x4   :  { %s1479_s23 = smov 0   ;;  %s1481_s24 = smov 0  }
   0x5   :  { %s1483_s25 = smov 0   ;;  %s1485_s26 = smov 0  }
   0x6 LB: > { %s1063_s27 = sadd.s32 4294967295, %s1428_s26   ;;  %s1064_s28 = sadd.s32 4294967294, %s1428_s26   ;;  %s1428_s26 = sphi %s1485_s26, %s21_s26   ;;  %s1424_s25 = sphi %s1483_s25, %s1712_s25   ;;  %s1420_s24 = sphi %s1481_s24, %s1711_s24   ;;  %s1416_s23 = sphi %s1479_s23, %s1710_s23   ;;  %s1412_s22 = sphi %s1477_s22, %s1709_s22   ;;  %s1408_s21 = sphi %s1475_s21, %s1708_s21  }
   0x7   : > { %s33_s29 = sadd.s32 1, %s1424_s25  ;;  %s180_s30 = sadd.s32 1, %s1416_s23 }
   0x8   : > { %p35_p0 = scmp.ge.s32.totalorder %s33_s29, 2  ;;  %p190_p1 = scmp.ne.s32.totalorder %s1416_s23, %s1412_s22 }
   0x9   : > { %p191_p2 = scmp.eq.s32.totalorder %s1063_s27, 1  ;;  %p196_p3 = scmp.ne.s32.totalorder %s1412_s22, %s1408_s21 }
   0xa   : > { %s1714_s29 = smov (%p35_p0, %s33_s29), 0  ;;  %p197_p5 = scmp.eq.s32.totalorder %s1064_s28, 1 }
   0xb   : > { %p1515_p4 = por %p191_p2, %p190_p1  ;;  %s175_s8 = ssub.s32 %s1424_s25, %s1714_s29 }
   0xc   : > { %p1065_p6 = scmp.ge.s32.totalorder %s1428_s26, 1  ;;  %p178_p7 = scmp.eq.s32.totalorder %s175_s8, 0 }
   0xd   : > { %s1699_s7 = scalar_select %p1515_p4, 1, 0 }
   0xe   : > { %p1522_p8 = por %p197_p5, %p196_p3  ;;  %p204_p9 = scmp.lt.s32.totalorder %s1428_s26, 3 }
   0xf   : > { %s1528_s10 = scalar_select %p178_p7, %s1416_s23, %s180_s30  }
  0x10   : > { %s1700_s9 = scalar_select %p1522_p8, 1, 0 }
  0x11   : > { %p1530_p10 = pnand %p1065_p6, %p204_p9  ;;  %p1534_p11 = scmp.eq.s32.totalorder %s1063_s27, 0 }
  0x12   : > { %s217_s15 = sshll.u32 %s1690_s2, 4  ;;  %s228_s18 = sshll.u32 %s1691_s3, 4  ;;  %s218_s15 = int_to_ptr.vmem [resolvable:$true] %s217_s15  ;;  %s229_s18 = int_to_ptr.vmem [resolvable:$true] %s228_s18 }
  0x13   : > { %s1701_s11 = scalar_select %p1530_p10, 1, 0 }
  0x14   : > { %s1702_s12 = scalar_select %p1534_p11, 1, 0 }
  0x15   : > { %p1238_p12 = pneg %p1530_p10  ;;  %s1312_s20 = scalar_lea.vmem %s218_s15, 16 }
  0x16   : > { %p1313_p0 = scmp.ne.s32.totalorder %s218_s15, %s1312_s20  ;;  %p1320_p5 = scmp.lt.s32.totalorder %s218_s15, %s218_s15 }
  0x17   : > { %p1548_p13 = pnand %p1534_p11, %p1238_p12  ;;  %p1321_p6 = scmp.lt.s32.totalorder %s1312_s20, %s1312_s20 }
  0x19   : > { %p1314_p1 = pneg %p1548_p13  ;;  %p1322_p7 = por %p1321_p6, %p1320_p5 }
  0x1b   : > { %p1315_p2 = pnand %p1314_p1, %p1313_p0 }
  0x1d   : > { %p1316_p3 = pneg %p1315_p2 }
  0x1f   : > { %p1323_p9 = pnand %p1322_p7, %p1316_p3 }
  0x21   : > { %1326 = shalt.err (!%p1323_p9)
}
  0x22   : > { %s1430_s27 = smov [#allocation2]   ;;  %s1327_s28 = scalar_lea.vmem %s229_s18, 16 }
  0x23   : > { %1241 = dma.vmem_to_smem (!%p1548_p13), %s218_s15, 16, %s1430_s27, [#allocation4]  }
  0x24   : > { %p1328_p12 = scmp.ne.s32.totalorder %s229_s18, %s1327_s28  ;;  %p1335_p11 = scmp.lt.s32.totalorder %s229_s18, %s229_s18 }
  0x25   : > { %p1336_p10 = scmp.lt.s32.totalorder %s1327_s28, %s1327_s28 }
  0x26   : > { %p1330_p8 = pnand %p1328_p12, %p1314_p1 }
  0x27   : > { %p1337_p0 = por %p1336_p10, %p1335_p11 }
  0x28   : > { %p1331_p4 = pneg %p1330_p8 }
  0x2a   : > { %p1338_p2 = pnand %p1337_p0, %p1331_p4 }
  0x2c   : > { %1341 = shalt.err (!%p1338_p2)
}
  0x2d   : > { %s1431_s30 = smov [#allocation5]   ;;  %p1704_p3 = scmp.ne.s32.totalorder %s1701_s11, 0 }
  0x2e   : > { %1244 = dma.vmem_to_smem (!%p1548_p13), %s229_s18, 16, %s1431_s30, [#allocation6]  }
  0x2f   : > { %268 = sbr.rel (%p1704_p3) target bundleno = 655 (0x28f), region = 44  ;;  %p1705_p5 = scmp.ne.s32.totalorder (!%p1704_p3), %s1702_s12, 0 }
  0x36   : > { %1395 = dma.done.wait (%p1705_p5), [#allocation4], 16  }
  0x37   : > { %1397 = vsyncadd (%p1705_p5), [#allocation4], 4294967280 }
  0x38   : > { %1399 = dma.done.wait (%p1705_p5), [#allocation6], 16  }
  0x39   : > { %1401 = vsyncadd (%p1705_p5), [#allocation6], 4294967280 }
  0x3a   : > { %278 = sfence }
  0x3b   : > { %p313_p4 = scmp.lt.s32.totalorder %s1420_s24, 1  ;;  %v331_v0 = vld [vmem:[%s1692_s4] sm:$0xff]  ;;  %v332_v1 = vld [vmem:[%s1692_s4 + $0x8] sm:$0xff]  ;;  %v1432_v2 = vmov 0.0   ;;  %vm346_vm0 = vcmask 1043456   ;;  %vm1433_vm1 = vmmov 0  }
  0x3c   : > { %1160 = vmatprep.subr.bf16.mxu1 %v1432_v2  ;;  %v335_v3 = vpack.c.bf16 %v332_v1, %v331_v0  ;;  %1154 = vmatprep.subr.bf16.mxu0 %v1432_v2  ;;  %s1434_s19 = smov 120   ;;  %s1435_s20 = smov 104   ;;  %vm342_vm2 = vcmask 64512   ;;  %v333_v8 = vld [vmem:[%s1692_s4 + $0x10] sm:$0xff]  ;;  %v334_v9 = vld [vmem:[%s1692_s4 + $0x18] sm:$0xff]  ;;  %vm467_vm3 = vcmask 130048  }
  0x3d   : > { %s1576_s15 = scalar_select %p313_p4, %s1420_s24, 1  ;;  %1162 = vmatprep.mubr.msk.bf16.mxu1 %vm1433_vm1, %v1432_v2  ;;  %1156 = vmatprep.mubr.msk.bf16.mxu0 %vm1433_vm1, %v1432_v2  ;;  %v336_v10 = vpack.c.bf16 %v334_v9, %v333_v8  ;;  %v1102_v9 = vld [vmem:[%s1693_s5] ss:$0 sm:$0xff]  ;;  %vm931_vm4 = vcmask 261120  }
  0x3e   : > { %v406_v4 = vrot.slane %v335_v3, 4  ;;  %v348_v5 = vsel %vm346_vm0, %v335_v3, 0  ;;  %s1436_s27 = smov 112   ;;  %s1082_s14 = sld [smem:[#allocation2 + $0x1]] }
  0x3f   : > { %s1109_s12 = sshll.u32 %s1576_s15, 3  ;;  %1155 = vmatpush3.bf16.msra.mxu0 %v348_v5  ;;  %v636_v11 = vsel %vm346_vm0, %v336_v10, 0  ;;  %v778_v13 = vrot.slane %v336_v10, 4  ;;  %s1108_s11 = sshll.u32 %s1576_s15, 5 }
  0x40   : > { %s326_s18 = scalar_lea.vmem %s1689_s1, %s1109_s12  ;;  %v411_v6 = vsel %vm346_vm0, %v406_v4, 0  ;;  %s1604_s17 = scalar_lea.vmem %s1688_s0, %s1108_s11 }
  0x41   : > { %v1311_v7 = vld [vmem:[%s326_s18] sm:$0xff]   ;;  %1161 = vmatpush3.bf16.msra.mxu1 %v411_v6  ;;  %v783_v15 = vsel %vm346_vm0, %v778_v13, 0  ;;  %s1083_s18 = sld [smem:[#allocation5 + $0x1]]  ;;  %v1127_v17 = vld [vmem:[%s1604_s17 + $0x8] sm:$0xff]   ;;  %s395_s15 = sld [smem:[#allocation2]]  ;;  %v1128_v41 = vld [vmem:[%s1604_s17 + $0x10] sm:$0xff]  }
  0x42   : > { %1180 = vmatprep.subr.bf16.mxu1 %v1432_v2  ;;  %403 = vrot.lane.b32.xlu0 %v1311_v7, %s1434_s19  ;;  %v1117_v18 = vunpack.c.l.bf16 %v1127_v17  ;;  %v1118_v19 = vunpack.c.h.bf16 %v1127_v17  ;;  %v1112_v31 = vld [vmem:[%s1604_s17] sm:$0xff]   ;;  %s1609_s19 = sld [smem:[#allocation5]]  ;;  %v1121_v44 = vunpack.c.l.bf16 %v1128_v41  ;;  %s1618_s28 = sld [smem:[#allocation2 + $0x3]]  ;;  %v1129_v54 = vld [vmem:[%s1604_s17 + $0x18] sm:$0xff]   ;;  %v1122_v56 = vunpack.c.h.bf16 %v1128_v41 }
  0x43   : > { %775 = vrot.lane.b32.xlu1 %v1311_v7, %s1435_s20  ;;  %1157 = vmatmul.mubr.msk.bf16.vlgmr.msra.gmra.mrb[0].mxu0 %vm342_vm2, %v1311_v7  ;;  %v1113_v32 = vunpack.c.l.bf16 %v1112_v31  ;;  %s1611_s20 = sld [smem:[#allocation2 + $0x2]]  ;;  %v1114_v42 = vunpack.c.h.bf16 %v1112_v31  ;;  %s1099_s30 = sld [smem:[#allocation5 + $0x3]]  ;;  %v1125_v58 = vunpack.c.l.bf16 %v1129_v54  ;;  %v1126_v5 = vunpack.c.h.bf16 %v1129_v54 }
  0x44   : > { %v460_v20 = vstv %s1082_s14  ;;  %s309_s8 = sand.u32 1, %s1412_s22   ;;  %s1110_s17 = sshll.u32 %s1420_s24, 8 }
  0x45   : > { %v461_v21 = vmul.f32 %v1117_v18, %v460_v20  ;;  %v462_v22 = vmul.f32 %v1118_v19, %v460_v20  ;;  %s1072_s13 = sshll.u32 %s309_s8, 4  ;;  %p1706_p10 = scmp.ne.s32.totalorder %s1699_s7, 0 }
  0x46   : > { %630 = vrot.lane.b32.xlu0 %v1311_v7, %s1436_s27  ;;  %s1615_s27 = sld [smem:[#allocation5 + $0x2]]  ;;  %s311_s12 = scalar_lea.vmem [#allocation7], %s1072_s13 }
  0x47   : > { %v464_v23 = vstv %s1083_s18  ;;  %v396_v33 = vstv %s395_s15  ;;  %s950_s16 = sshll.u32 %s311_s12, 4  ;;  %s1635_s16 = int_to_ptr.vmem [resolvable:$true] %s950_s16 }
  0x48   : > { %v465_v24 = vadd.f32 %v464_v23, %v461_v21  ;;  %v466_v25 = vadd.f32 %v464_v23, %v462_v22  ;;  %v397_v37 = vmul.f32 %v1113_v32, %v396_v33  ;;  %v400_v40 = vstv %s1609_s19  ;;  %s1640_s19 = scalar_lea.hbm %s1694_s6, %s1110_s17  ;;  %s1342_s24 = scalar_lea.vmem %s1635_s16, 256 }
  0x49   : > { %v685_v45 = vstv %s1611_s20  ;;  %v398_v48 = vmul.f32 %v1114_v42, %v396_v33  ;;  %v832_v59 = vstv %s1618_s28  ;;  %v836_v3 = vstv %s1099_s30  ;;  %s1642_s20 = scalar_lea.sflag [#allocation3], %s309_s8  ;;  %p1343_p8 = scmp.ne.s32.totalorder %s1635_s16, %s1342_s24 }
  0x4a   : > { %1170 = vmatprep.mubr.msk.f32.mxu0 %vm467_vm3, %v465_v24  ;;  %v401_v43 = vadd.f32 %v400_v40, %v397_v37  ;;  %v686_v50 = vmul.f32 %v1121_v44, %v685_v45  ;;  %v687_v62 = vmul.f32 %v1122_v56, %v685_v45  ;;  %v833_v0 = vmul.f32 %v1125_v58, %v832_v59 }
  0x4b   : > { %v402_v55 = vadd.f32 %v400_v40, %v398_v48  ;;  %v834_v7 = vmul.f32 %v1126_v5, %v832_v59  ;;  %p1344_p11 = pnand %p1343_p8, %p1706_p10 }
  0x4c   : > { %v689_v53 = vstv %s1615_s27  ;;  %v837_v6 = vadd.f32 %v836_v3, %v833_v0  ;;  %s1437_s27 = smov [#allocation7]  }
  0x4d   : > { %v690_v57 = vadd.f32 %v689_v53, %v686_v50  ;;  %v691_v4 = vadd.f32 %v689_v53, %v687_v62  ;;  %v838_v8 = vadd.f32 %v836_v3, %v834_v7  ;;  %p1345_p13 = pneg %p1344_p11  ;;  %s1346_s28 = sshll.u32 %s1437_s27, 4  ;;  %s1347_s28 = int_to_ptr.vmem [resolvable:$false] %s1346_s28 }
  0x4e   : > { %s1348_s30 = scalar_lea.vmem %s1347_s28, 512  ;;  %p1349_p1 = scmp.lt.s32.totalorder %s1635_s16, %s1347_s28 }
  0x4f   : > { %p1350_p6 = scmp.lt.s32.totalorder %s1348_s30, %s1342_s24 }
  0x51   : > { %p1351_p7 = por %p1350_p6, %p1349_p1 }
  0x53   : > { %p1352_p9 = pnand %p1351_p7, %p1345_p13 }
  0xb4   : > { %v404_v12 = vpop.permute.xlu0 %403 }
  0xb5   : > { %1163 = vmatmul.mubr.msk.bf16.vlgmr.msra.gmra.mrb[0].mxu1 %vm342_vm2, %v404_v12  ;;  %v776_v16 = vpop.permute.xlu1 %775 }
  0xb6   : > { %1181 = vmatpush3.bf16.msra.mxu1 %v636_v11  ;;  %1182 = vmatprep.mubr.msk.bf16.mxu1 %vm1433_vm1, %v1432_v2 }
  0xb7   : > { %1193 = vmatprep.subr.bf16.mxu1 %v1432_v2 }
  0xb8   : > { %v631_v14 = vpop.permute.xlu0 %630 }
  0xbd   : > { %1183 = vmatmul.mubr.msk.bf16.vlgmr.msra.gmra.mrb[4].mxu1 %vm342_vm2, %v631_v14 }
  0xbe   : > { %1194 = vmatpush3.bf16.msra.mxu1 %v783_v15  ;;  %1195 = vmatprep.mubr.msk.bf16.mxu1 %vm1433_vm1, %v1432_v2 }
  0xc5   : > { %1196 = vmatmul.mubr.msk.bf16.vlgmr.msra.gmra.mrb[8].mxu1 %vm342_vm2, %v776_v16 }
 0x116   : > { %v384_v26 = vpop.f32.mrb[0].mxu0 }
 0x117   : > { %v1158_v27 = vpop.f32.mrb[1].mxu0 }
 0x118   : > { %v387_v28 = vpop.f32.mrb[2].mxu0 }
 0x119   : > { %v1210_v29 = vpack.c.bf16 %v387_v28, %v384_v26  ;;  %v1159_v30 = vpop.f32.mrb[3].mxu0 }
 0x188   : > { %v447_v34 = vpop.f32.mrb[0].mxu1 }
 0x189   : > { %v1164_v35 = vpop.f32.mrb[1].mxu1 }
 0x18a   : > { %v450_v36 = vpop.f32.mrb[2].mxu1 }
 0x18b   : > { %v1206_v38 = vpack.c.bf16 %v450_v36, %v447_v34  ;;  %v1165_v39 = vpop.f32.mrb[3].mxu1 }
 0x18d   : > { %1207 = vmatprep.subr.bf16.mxu0 %v1206_v38 }
 0x18e   : > { %1209 = vmatpush3.bf16.msra.mxu0 %v1206_v38 }
 0x18f   : > { %1211 = vmatprep.subr.bf16.mxu0 %v1210_v29 }
 0x190   : > { %v672_v46 = vpop.f32.mrb[4].mxu1 }
 0x191   : > { %1171 = vmatmul.mubr.msk.f32.vlgmr.msra.gmra.mrb[4].mxu0 %vm467_vm3, %v466_v25  ;;  %v1184_v47 = vpop.f32.mrb[5].mxu1 }
 0x192   : > { %1213 = vmatpush3.bf16.msra.mxu0 %v1210_v29  ;;  %v675_v49 = vpop.f32.mrb[6].mxu1  ;;  %1177 = vmatprep.mubr.msk.f32.mxu0 %vm467_vm3, %v401_v43 }
 0x193   : > { %v1214_v51 = vpack.c.bf16 %v675_v49, %v672_v46  ;;  %v1185_v52 = vpop.f32.mrb[7].mxu1 }
 0x195   : > { %1215 = vmatprep.subr.bf16.mxu0 %v1214_v51 }
 0x198   : > { %v819_v60 = vpop.f32.mrb[8].mxu1 }
 0x199   : > { %1178 = vmatmul.mubr.msk.f32.vlgmr.msra.gmra.mrb[4].mxu0 %vm467_vm3, %v402_v55  ;;  %v1197_v61 = vpop.f32.mrb[9].mxu1 }
 0x19a   : > { %1217 = vmatpush3.bf16.msra.mxu0 %v1214_v51  ;;  %v822_v63 = vpop.f32.mrb[10].mxu1  ;;  %1190 = vmatprep.mubr.msk.f32.mxu0 %vm467_vm3, %v690_v57 }
 0x19b   : > { %v1218_v1 = vpack.c.bf16 %v822_v63, %v819_v60  ;;  %v1198_v2 = vpop.f32.mrb[11].mxu1 }
 0x19d   : > { %1219 = vmatprep.subr.bf16.mxu0 %v1218_v1 }
 0x1a1   : > { %1191 = vmatmul.mubr.msk.f32.vlgmr.msra.gmra.mrb[4].mxu0 %vm467_vm3, %v691_v4 }
 0x1a2   : > { %1221 = vmatpush3.bf16.msra.mxu0 %v1218_v1  ;;  %1203 = vmatprep.mubr.msk.f32.mxu0 %vm467_vm3, %v837_v6 }
 0x1a9   : > { %1204 = vmatmul.mubr.msk.f32.vlgmr.msra.gmra.mrb[4].mxu0 %vm467_vm3, %v838_v8 }
 0x27c   : > { %v1205_v10 = vpop.f32.mrb[4].mxu0 }
 0x27d   : > { %v930_v11 = vadd.f32 %v1205_v10, %v1102_v9  ;;  %v911_v12 = vpop.f32.mrb[5].mxu0 }
 0x27e   : > { %v929_v13 = vadd.f32 %v1102_v9, %v911_v12 }
 0x27f   : > { %933 = vst.msk [vmem:[%s311_s12 + $0x8] sm:$0xff] %vm931_vm4, %v930_v11 }
 0x280   : > { %932 = vst.msk [vmem:[%s311_s12] sm:$0xff] %vm931_vm4, %v929_v13 }
 0x281   : > { %1355 = shalt.err (!%p1352_p9)
}
 0x282   : > { %s1356_s8 = scalar_lea.hbm %s1640_s19, 256  ;;  %s1360_s14 = scalar_lea.hbm %s1694_s6, 512 }
 0x283   : > { %p1357_p12 = scmp.ne.s32.totalorder %s1640_s19, %s1356_s8  ;;  %p1361_p3 = scmp.lt.u32.totalorder %s1640_s19, %s1694_s6 }
 0x284   : > { %p1362_p5 = scmp.lt.u32.totalorder %s1360_s14, %s1356_s8  ;;  %p1364_p8 = scmp.lt.u32.totalorder %s1356_s8, %s1640_s19 }
 0x285   : > { %p1358_p0 = pnand %p1357_p12, %p1706_p10 }
 0x286   : > { %p1363_p4 = por %p1362_p5, %p1361_p3 }
 0x287   : > { %p1359_p2 = pneg %p1358_p0 }
 0x288   : > { %p1365_p11 = por %p1364_p8, %p1363_p4 }
 0x28a   : > { %p1366_p13 = pnand %p1365_p11, %p1359_p2 }
 0x28c   : > { %1369 = shalt.err (!%p1366_p13)
}
 0x28d   : > { %s1438_s18 = smov 128   ;;  %s1439_s15 = smov 8  }
 0x28e   : > { %1236 = dma.vmem_to_hbm [thread:$0]  (%p1706_p10), %s1635_s16, 256, %s1640_s19, %s1642_s20, %s1438_s18, %s1438_s18, %s1439_s15  }
 0x28f PF: > { %p1253_p1 = scmp.ge.s32.totalorder %s1428_s26, 2  ;;  %s965_s24 = sand.u32 1, %s1408_s21  }
 0x290   : > { %p1707_p6 = scmp.ne.s32.totalorder %s1700_s9, 0  ;;  %s966_s27 = scalar_lea.sflag [#allocation3], %s965_s24 }
 0x292   : > { %p1246_p7 = pnand %p1253_p1, %p1707_p6 }
 0x294   : > { %1403 = dma.done.wait (!%p1246_p7), %s966_s27, 256  }
 0x295   : > { %1405 = vsyncadd (!%p1246_p7), %s966_s27, 4294967040  ;;  %s21_s26 = sadd.s32 1, %s1428_s26   ;;  %s1708_s21 = smov %s1412_s22 }
 0x296   : > { %p18_p9 = scmp.ge.s32.totalorder %s21_s26, 4   ;;  %s1709_s22 = smov %s1416_s23 }
 0x297   : > { %s1710_s23 = smov %s1528_s10  ;;  %s1711_s24 = smov %s1424_s25 }
 0x298   : > { %s1712_s25 = smov %s1714_s29  ;;  %20 = sbr.rel (!%p18_p9) target bundleno = 6 (0x6), region = 94 }
 0x29f   :  { %971 = vsyncpa [#allocation3], 1 }
 0x2a0   :  { %973 = vsyncpa [#allocation3 + $0x1], 1 }
 0x2a1   :  { %974 = vsyncpa [#allocation4], 1 }
 0x2a2   :  { %976 = vsyncpa [#allocation4 + $0x1], 1 }
 0x2a3   :  { %977 = vsyncpa [#allocation6], 1 }

// kernel: reattention_forward.2
= control target key start
LH: loop header
LB: loop body
LE: loop exit
PB: predicated region body
PF: predicated region fallthrough
CT: control target
= control target key end

     0   :  { %12 = vsyncpa [#allocation4], 0  ;;  %s2347_s0 = inlined_call_operand.hbm [shape: f32[2,16,32], index: 0, kind: input, shape index: {}]   ;;  %s2348_s1 = inlined_call_operand.hbm [shape: f32[32,96], index: 1, kind: input, shape index: {}]   ;;  %s2349_s2 = inlined_call_operand.vmem [shape: f32[4,4], index: 2, kind: input, shape index: {}]   ;;  %s2350_s3 = inlined_call_operand.vmem [shape: f32[4], index: 3, kind: input, shape index: {}]   ;;  %s2351_s4 = inlined_call_operand.vmem [shape: bf16[2,4,16,16], index: 4, kind: output, shape index: {0}]   ;;  %s2352_s5 = inlined_call_operand.vmem [shape: bf16[2,16,32], index: 5, kind: output, shape index: {1}]   ;;  %s2353_s6 = inlined_call_operand.vmem [shape: f32[2,2,4], index: 6, kind: output, shape index: {2}]  }
   0x1   :  { %14 = vsyncpa [#allocation4 + $0x1], 0 }
   0x2   :  { %15 = vsyncpa [#allocation7], 0 }
   0x3   :  { %16 = vsyncpa [#allocation5], 0 }
   0x4   :  { %17 = vsyncpa [#allocation10], 0  ;;  %s1902_s21 = smov 0   ;;  %s1904_s22 = smov 0  }
   0x5   :  { %s1906_s23 = smov 0   ;;  %s1908_s24 = smov 0  }
   0x6 LB: > { %s1921_s25 = sadd.s32 4294967295, %s1851_s24   ;;  %p43_p0 = scmp.ne.s32.totalorder %s1843_s22, %s1839_s21  ;;  %s1851_s24 = sphi %s1908_s24, %s2372_s24   ;;  %s1847_s23 = sphi %s1906_s23, %s2371_s23   ;;  %s1843_s22 = sphi %s1904_s22, %s2370_s22   ;;  %s1839_s21 = sphi %s1902_s21, %s2369_s21  }
   0x7   : > { %p2354_p1 = scmp.eq.s32.totalorder %s1921_s25, 0  ;;  %p1407_p2 = scmp.ge.s32.totalorder %s1851_s24, 1 }
   0x8   : > { %p195_p3 = scmp.lt.s32.totalorder %s1851_s24, 3  ;;  %s1853_s28 = smov [#allocation6]  }
   0x9   : > { %p1929_p4 = por %p2354_p1, %p43_p0  ;;  %s207_s29 = sshll.u32 %s1853_s28, 4  ;;  %s1937_s29 = int_to_ptr.vmem [resolvable:$true] %s207_s29 }
   0xa   : > { %p1933_p5 = pnand %p1407_p2, %p195_p3  ;;  %s221_s8 = sshll.u32 %s2349_s2, 4  ;;  %s1950_s8 = int_to_ptr.vmem [resolvable:$true] %s221_s8 }
   0xb   : > { %s2356_s26 = scalar_select %p1929_p4, 1, 0 }
   0xc   : > { %p1599_p6 = pneg %p1933_p5  ;;  %s232_s12 = sshll.u32 %s2350_s3, 4  ;;  %s1955_s12 = int_to_ptr.vmem [resolvable:$true] %s232_s12 }
   0xd   : > { %s1717_s15 = scalar_lea.hbm %s2348_s1, 512 }
   0xe   : > { %p1946_p7 = pnand %p1599_p6, %p2354_p1  ;;  %p1718_p8 = scmp.ne.s32.totalorder %s2348_s1, %s1717_s15 }
   0xf   : > { %p1724_p12 = scmp.lt.u32.totalorder %s1717_s15, %s2348_s1 }
  0x10   : > { %p1719_p9 = pneg %p1946_p7 }
  0x12   : > { %p1720_p10 = pnand %p1719_p9, %p1718_p8 }
  0x14   : > { %p1721_p11 = pneg %p1720_p10 }
  0x16   : > { %p1726_p13 = pnand %p1724_p12, %p1721_p11 }
  0x18   : > { %1729 = shalt.err (!%p1726_p13)
}
  0x19   : > { %s1730_s20 = scalar_lea.vmem %s1937_s29, 512  ;;  %p1738_p6 = scmp.lt.s32.totalorder %s1937_s29, %s1937_s29 }
  0x1a   : > { %p1731_p0 = scmp.ne.s32.totalorder %s1937_s29, %s1730_s20  ;;  %p1739_p8 = scmp.lt.s32.totalorder %s1730_s20, %s1730_s20 }
  0x1c   : > { %p1733_p2 = pnand %p1731_p0, %p1719_p9  ;;  %p1740_p10 = por %p1739_p8, %p1738_p6 }
  0x1e   : > { %p1734_p3 = pneg %p1733_p2 }
  0x20   : > { %p1741_p1 = pnand %p1740_p10, %p1734_p3 }
  0x22   : > { %1744 = shalt.err (!%p1741_p1)
}
  0x23   : > { %s1854_s21 = smov 128   ;;  %s1855_s28 = smov 8  }
  0x24   : > { %1602 = dma.hbm_to_vmem [thread:$0]  (!%p1946_p7), %s2348_s1, 512, %s1937_s29, [#allocation7], %s1854_s21, %s1854_s21, %s1855_s28  }
  0x25   : > { %s1745_s10 = scalar_lea.vmem %s1950_s8, 64  ;;  %p1753_p13 = scmp.lt.s32.totalorder %s1950_s8, %s1950_s8 }
  0x26   : > { %p1746_p11 = scmp.ne.s32.totalorder %s1950_s8, %s1745_s10  ;;  %p1754_p0 = scmp.lt.s32.totalorder %s1745_s10, %s1745_s10 }
  0x28   : > { %p1748_p1 = pnand %p1746_p11, %p1719_p9  ;;  %p1755_p2 = por %p1754_p0, %p1753_p13 }
  0x2a   : > { %p1749_p12 = pneg %p1748_p1 }
  0x2c   : > { %p1756_p3 = pnand %p1755_p2, %p1749_p12 }
  0x2e   : > { %1759 = shalt.err (!%p1756_p3)
}
  0x2f   : > { %s1856_s11 = smov [#allocation8]   ;;  %s1760_s29 = scalar_lea.vmem %s1955_s12, 16 }
  0x30   : > { %1605 = dma.vmem_to_smem (!%p1946_p7), %s1950_s8, 64, %s1856_s11, [#allocation5]  }
  0x31   : > { %p1761_p6 = scmp.ne.s32.totalorder %s1955_s12, %s1760_s29  ;;  %p1768_p11 = scmp.lt.s32.totalorder %s1955_s12, %s1955_s12 }
  0x32   : > { %p1769_p1 = scmp.lt.s32.totalorder %s1760_s29, %s1760_s29 }
  0x33   : > { %p1763_p8 = pnand %p1761_p6, %p1719_p9 }
  0x34   : > { %p1770_p12 = por %p1769_p1, %p1768_p11 }
  0x35   : > { %p1764_p10 = pneg %p1763_p8 }
  0x37   : > { %p1771_p13 = pnand %p1770_p12, %p1764_p10 }
  0x39   : > { %1774 = shalt.err (!%p1771_p13)
}
  0x3a   : > { %s1857_s13 = smov [#allocation9]   ;;  %s2008_s8 = sadd.s32 1, %s1851_s24  }
  0x3b   : > { %1608 = dma.vmem_to_smem (!%p1946_p7), %s1955_s12, 16, %s1857_s13, [#allocation10]  }
  0x3c   : > { %s27_s14 = ssub.s32 %s1851_s24, %s2008_s8  ;;  %s30_s15 = sadd.s32 1, %s1847_s23 }
  0x3d   : > { %p28_p9 = scmp.eq.s32.totalorder %s27_s14, 0  ;;  %p37_p0 = scmp.ne.s32.totalorder %s1847_s23, %s1843_s22 }
  0x3e   : > { %p38_p2 = scmp.eq.s32.totalorder %s1851_s24, 0  ;;  %p1616_p3 = scmp.lt.s32.totalorder %s1851_s24, 2 }
  0x3f   : > { %s2018_s9 = scalar_select %p28_p9, %s1847_s23, %s30_s15  }
  0x40   : > { %p39_p6 = por %p38_p2, %p37_p0  ;;  %s243_s16 = sand.u32 1, %s1847_s23  }
  0x41   : > { %s1412_s17 = sshll.u32 %s243_s16, 4  ;;  %s1479_s18 = sshll.u32 %s1851_s24, 8 }
  0x42   : > { %s2025_s30 = scalar_lea.hbm %s2347_s0, %s1479_s18  ;;  %s247_s12 = scalar_lea.vmem [#allocation3], %s1412_s17 }
  0x43   : > { %s254_s7 = sshll.u32 %s247_s12, 4  ;;  %p2029_p7 = pnand %p1616_p3, %p39_p6  ;;  %s2027_s7 = int_to_ptr.vmem [resolvable:$true] %s254_s7 }
  0x44   : > { %s2033_s24 = scalar_lea.sflag [#allocation4], %s243_s16  ;;  %s1775_s11 = scalar_lea.hbm %s2025_s30, 256 }
  0x45   : > { %p1776_p8 = scmp.ne.s32.totalorder %s2025_s30, %s1775_s11  ;;  %p1777_p10 = pneg %p2029_p7 }
  0x46   : > { %s1780_s14 = scalar_lea.hbm %s2347_s0, 512  ;;  %p1781_p12 = scmp.lt.u32.totalorder %s2025_s30, %s2347_s0 }
  0x47   : > { %p1778_p11 = pnand %p1777_p10, %p1776_p8  ;;  %p1782_p13 = scmp.lt.u32.totalorder %s1780_s14, %s1775_s11 }
  0x48   : > { %p1784_p0 = scmp.lt.u32.totalorder %s1775_s11, %s2025_s30 }
  0x49   : > { %p1779_p1 = pneg %p1778_p11  ;;  %p1783_p9 = por %p1782_p13, %p1781_p12 }
  0x4b   : > { %p1785_p2 = por %p1784_p0, %p1783_p9 }
  0x4d   : > { %p1786_p3 = pnand %p1785_p2, %p1779_p1 }
  0x4f   : > { %1789 = shalt.err (!%p1786_p3)
}
  0x50   : > { %s1790_s16 = scalar_lea.vmem %s2027_s7, 256  ;;  %s1858_s18 = smov [#allocation3]  }
  0x51   : > { %p1791_p6 = scmp.ne.s32.totalorder %s2027_s7, %s1790_s16  ;;  %s1795_s19 = sshll.u32 %s1858_s18, 4  ;;  %s1796_s19 = int_to_ptr.vmem [resolvable:$false] %s1795_s19 }
  0x52   : > { %s1797_s20 = scalar_lea.vmem %s1796_s19, 512  ;;  %p1798_p4 = scmp.lt.s32.totalorder %s2027_s7, %s1796_s19 }
  0x53   : > { %p1793_p8 = pnand %p1791_p6, %p1777_p10  ;;  %p1799_p12 = scmp.lt.s32.totalorder %s1797_s20, %s1790_s16 }
  0x55   : > { %p1794_p11 = pneg %p1793_p8  ;;  %p1800_p13 = por %p1799_p12, %p1798_p4 }
  0x57   : > { %p1801_p9 = pnand %p1800_p13, %p1794_p11 }
  0x59   : > { %1804 = shalt.err (!%p1801_p9)
}
  0x5a   : > { %1612 = dma.hbm_to_vmem [thread:$0]  (!%p2029_p7), %s2025_s30, 256, %s2027_s7, %s2033_s24, %s1854_s21, %s1854_s21, %s1855_s28  }
  0x5b   : > { %266 = sbr.rel (%p1933_p5) target bundleno = 1226 (0x4ca), region = 36  ;;  %s268_s12 = sand.u32 (!%p1933_p5), 1, %s1843_s22  }
  0x5c   : > { %s1416_s11 = sshll.u32 (!%p1933_p5), %s268_s12, 4  ;;  %s269_s29 = scalar_lea.sflag (!%p1933_p5), [#allocation4], %s268_s12 }
  0x5d   : > { %s272_s13 = scalar_lea.vmem (!%p1933_p5), [#allocation3], %s1416_s11  ;;  %p2360_p4 = scmp.ne.s32.totalorder (!%p1933_p5), %s2356_s26, 0 }
  0x62   : > { %1822 = dma.done.wait (%p2360_p4), %s269_s29, 256  }
  0x63   : > { %1824 = vsyncadd (%p2360_p4), %s269_s29, 4294967040  ;;  %p2361_p10 = scmp.eq.s32.totalorder %s1921_s25, 0 }
  0x65   : > { %1826 = dma.done.wait (%p2361_p10), [#allocation7], 512   ;;  %p2362_p1 = pmov %p2361_p10 }
  0x67   : > { %1828 = vsyncadd (%p2362_p1), [#allocation7], 4294966784  ;;  %p2363_p7 = pmov %p2362_p1 }
  0x68   : > { %p2364_p5 = pmov %p2362_p1 }
  0x69   : > { %1830 = dma.done.wait (%p2363_p7), [#allocation5], 64  }
  0x6a   : > { %1832 = vsyncadd (%p2364_p5), [#allocation5], 4294967232  ;;  %p2365_p0 = pmov %p2362_p1 }
  0x6c   : > { %1834 = dma.done.wait (%p2365_p0), [#allocation10], 16   ;;  %p2366_p2 = pmov %p2365_p0 }
  0x6e   : > { %1836 = vsyncadd (%p2366_p2), [#allocation10], 4294967280 }
  0x6f   : > { %289 = sfence }
  0x70   : > { %v339_v0 = vld [vmem:[#allocation6] sm:$0xff]  ;;  %v340_v1 = vld [vmem:[#allocation6 + $0x8] sm:$0xff]  ;;  %v341_v2 = vld [vmem:[#allocation6 + $0x10] sm:$0xff]  ;;  %vm343_vm0 = vcmask 261120   ;;  %vm446_vm1 = vcmask 64512   ;;  %s1859_s26 = smov 120  }
  0x71   : > { %v1553_v3 = vpack.c.bf16 %v340_v1, %v339_v0  ;;  %v342_v4 = vld [vmem:[#allocation6 + $0x18] sm:$0xff]  ;;  %v337_v5 = vld [vmem:[%s272_s13] sm:$0xff]  ;;  %s1860_s27 = smov 96   ;;  %s1861_s21 = smov 88   ;;  %vm2100_vm2 = vmpackc.low %vm446_vm1, %vm446_vm1  ;;  %vm532_vm3 = vcmask 130048   ;;  %vm437_vm4 = vcmask 257024  }
  0x72   : > { %v1557_v6 = vpack.c.bf16 %v342_v4, %v341_v2  ;;  %1522 = vmatprep.mubr.msk.f32.mxu0 %vm343_vm0, %v337_v5  ;;  %v338_v7 = vld [vmem:[%s272_s13 + $0x8] sm:$0xff]  ;;  %s1862_s28 = smov 112   ;;  %s1863_s30 = smov 80   ;;  %vm1073_vm5 = vcmask 125952   ;;  %vm1227_vm6 = vcmask 7168   ;;  %vm1229_vm7 = vcmask 15360  }
  0x73   : > { %1554 = vmatprep.subr.bf16.mxu0 %v1553_v3  ;;  %s1864_s7 = smov 72   ;;  %s1865_s10 = smov 104   ;;  %vm1231_vm8 = vcmask 23552   ;;  %vm1239_vm9 = vcmask 1040384   ;;  %vm1241_vm10 = vcmask 25600  }
  0x74   : > { %1556 = vmatpush3.bf16.msra.mxu0 %v1553_v3  ;;  %s1866_s24 = smov 64   ;;  %s2171_s14 = sld [smem:[#allocation8]] }
  0x75   : > { %1558 = vmatprep.subr.bf16.mxu0 %v1557_v6  ;;  %s2173_s15 = sld [smem:[#allocation9]]  ;;  %s2181_s19 = sld [smem:[#allocation9 + $0x1]] }
  0x76   : > { %s2175_s17 = sld [smem:[#allocation8 + $0x80]]  ;;  %p323_p3 = scmp.lt.s32.totalorder %s1921_s25, 1 }
  0x77   : > { %s2177_s16 = sld [smem:[#allocation8 + $0x100]]  ;;  %s2184_s20 = sld [smem:[#allocation9 + $0x2]] }
  0x78   : > { %1560 = vmatpush3.bf16.msra.mxu0 %v1557_v6  ;;  %s2179_s18 = sld [smem:[#allocation8 + $0x180]]  ;;  %s2186_s12 = sld [smem:[#allocation9 + $0x3]] }
  0x79   : > { %s2374_s25 = smov (!%p323_p3, %s1921_s25), 1  ;;  %s2202_s29 = sld [smem:[#allocation8 + $0x1]] }
  0x7a   : > { %s1481_s11 = sshll.u32 %s2374_s25, 3  ;;  %s2206_s13 = sld [smem:[#allocation8 + $0x81]] }
  0x7b   : > { %1523 = vmatmul.mubr.msk.f32.vlgmr.msra.gmra.mrb[0].mxu0 %vm343_vm0, %v338_v7 }
 0x14e   : > { %v2083_v8 = vpop.f32.mrb[0].mxu0 }
 0x14f   : > { %v2085_v9 = vpop.f32.mrb[1].mxu0 }
 0x150   : > { %598 = vrot.lane.b32.xlu1 %v2085_v9, %s1859_s26  ;;  %1529 = vmatprep.mubr.msk.f32.mxu1 %vm446_vm1, %v2085_v9  ;;  %v1665_v10 = vpack.i.bf16 %v2083_v8, %v2085_v9 }
 0x152   : > { %1666 = vrot.lane.b32.xlu0 %v1665_v10, %s1860_s27  ;;  %s2210_s27 = sld [smem:[#allocation8 + $0x181]] }
 0x154   : > { %600 = vrot.lane.b32.xlu1 %v2083_v8, %s1859_s26  ;;  %s2208_s26 = sld [smem:[#allocation8 + $0x101]] }
 0x156   : > { %1671 = vrot.lane.b32.xlu0 %v1665_v10, %s1861_s21 }
 0x158   : > { %753 = vrot.lane.b32.xlu1 %v2085_v9, %s1862_s28 }
 0x15a   : > { %1676 = vrot.lane.b32.xlu0 %v1665_v10, %s1863_s30  ;;  %s2215_s30 = scalar_lea.vmem %s2352_s5, %s1481_s11 }
 0x15c   : > { %1681 = vrot.lane.b32.xlu1 %v1665_v10, %s1864_s7  ;;  %s2233_s7 = sld [smem:[#allocation8 + $0x2]] }
 0x15e   : > { %755 = vrot.lane.b32.xlu0 %v2083_v8, %s1862_s28 }
 0x160   : > { %910 = vrot.lane.b32.xlu1 %v2083_v8, %s1865_s10 }
 0x162   : > { %908 = vrot.lane.b32.xlu0 %v2085_v9, %s1865_s10  ;;  %s2235_s10 = sld [smem:[#allocation8 + $0x82]] }
 0x1c2   : > { %v599_v11 = vpop.permute.xlu1 %598 }
 0x1c3   : > { %1536 = vmatprep.mubr.msk.f32.mxu0 %vm446_vm1, %v599_v11 }
 0x1c4   : > { %v1667_v12 = vpop.permute.xlu0 %1666 }
 0x1c5   : > { %v1669_v13 = vunpack.i.h.bf16 %v1667_v12  ;;  %v1668_v14 = vunpack.i.l.bf16 %v1667_v12 }
 0x1c6   : > { %v601_v15 = vpop.permute.xlu1 %600 }
 0x1c7   : > { %v1561_v17 = vpack.c.bf16 %v1669_v13, %v1668_v14 }
 0x1c8   : > { %v1672_v18 = vpop.permute.xlu0 %1671 }
 0x1c9   : > { %v1674_v19 = vunpack.i.h.bf16 %v1672_v18  ;;  %v1673_v20 = vunpack.i.l.bf16 %v1672_v18  ;;  %1563 = vmatprep.subr.msk.bf16.mxu1 %vm2100_vm2, %v1561_v17 }
 0x1ca   : > { %v754_v21 = vpop.permute.xlu1 %753  ;;  %1566 = vmatpush3.bf16.xpose.msk.msra.mxu1 %vm2100_vm2, %v1561_v17 }
 0x1cb   : > { %v1567_v22 = vpack.c.bf16 %v1674_v19, %v1673_v20 }
 0x1cc   : > { %v1677_v23 = vpop.permute.xlu0 %1676 }
 0x1cd   : > { %v1679_v24 = vunpack.i.h.bf16 %v1677_v23  ;;  %v1678_v25 = vunpack.i.l.bf16 %v1677_v23  ;;  %1569 = vmatprep.subr.msk.bf16.mxu0 %vm2100_vm2, %v1567_v22 }
 0x1ce   : > { %v1682_v26 = vpop.permute.xlu1 %1681  ;;  %1572 = vmatpush3.bf16.xpose.msk.msra.mxu0 %vm2100_vm2, %v1567_v22 }
 0x1cf   : > { %v1573_v27 = vpack.c.bf16 %v1679_v24, %v1678_v25  ;;  %v1684_v28 = vunpack.i.h.bf16 %v1682_v26  ;;  %v1683_v29 = vunpack.i.l.bf16 %v1682_v26 }
 0x1d0   : > { %v756_v30 = vpop.permute.xlu0 %755 }
 0x1d1   : > { %v1579_v31 = vpack.c.bf16 %v1684_v28, %v1683_v29  ;;  %1530 = vmatmul.mubr.msk.f32.vlgmr.msra.gmra.mrb[0].mxu1 %vm446_vm1, %v2083_v8  ;;  %1575 = vmatprep.subr.msk.bf16.mxu1 %vm2100_vm2, %v1573_v27 }
 0x1d2   : > { %1578 = vmatpush3.bf16.xpose.msk.msra.mxu1 %vm2100_vm2, %v1573_v27  ;;  %1543 = vmatprep.mubr.msk.f32.mxu1 %vm446_vm1, %v754_v21  ;;  %v911_v33 = vpop.permute.xlu1 %910 }
 0x1d3   : > { %1581 = vmatprep.subr.msk.bf16.mxu0 %vm2100_vm2, %v1579_v31 }
 0x1d4   : > { %v909_v32 = vpop.permute.xlu0 %908 }
 0x1d5   : > { %1537 = vmatmul.mubr.msk.f32.vlgmr.msra.gmra.mrb[2].mxu0 %vm446_vm1, %v601_v15 }
 0x1d6   : > { %1584 = vmatpush3.bf16.xpose.msk.msra.mxu0 %vm2100_vm2, %v1579_v31  ;;  %1550 = vmatprep.mubr.msk.f32.mxu0 %vm446_vm1, %v909_v32 }
 0x1d9   : > { %1544 = vmatmul.mubr.msk.f32.vlgmr.msra.gmra.mrb[2].mxu1 %vm446_vm1, %v756_v30 }
 0x1dd   : > { %1551 = vmatmul.mubr.msk.f32.vlgmr.msra.gmra.mrb[4].mxu0 %vm446_vm1, %v911_v33 }
 0x2a4   : > { %v1531_v34 = vpop.f32.mrb[0].mxu1 }
 0x2a5   : > { %v531_v35 = vmul.f32 0.35355338, %v1531_v34  ;;  %v521_v36 = vpop.f32.mrb[1].mxu1 }
 0x2a6   : > { %v530_v37 = vmul.f32 0.35355338, %v521_v36  ;;  %v1482_v36 = vpack.c.bf16 %v2085_v9, %v2085_v9 }
 0x2a7   : > { %v536_v38 = vsel %vm532_vm3, %v531_v35, -inf }
 0x2a8   : > { %v1538_v39 = vpop.f32.mrb[2].mxu0  ;;  %537 = vmax.xlane.f32.xlu1 %v536_v38  ;;  %v533_v40 = vsel %vm532_vm3, %v530_v37, -inf }
 0x2a9   : > { %v680_v41 = vpop.f32.mrb[3].mxu0  ;;  %534 = vmax.xlane.f32.xlu0 %v533_v40  ;;  %v690_v43 = vmul.f32 0.35355338, %v1538_v39  ;;  %v556_v40 = vstv %s2171_s14  ;;  %s2241_s14 = sld [smem:[#allocation8 + $0x182]] }
 0x2aa   : > { %v689_v42 = vmul.f32 0.35355338, %v680_v41 }
 0x2ab   : > { %v694_v51 = vsel %vm532_vm3, %v690_v43, -inf }
 0x2ac   : > { %v1545_v44 = vpop.f32.mrb[2].mxu1  ;;  %v691_v45 = vsel %vm532_vm3, %v689_v42, -inf }
 0x2ad   : > { %v835_v46 = vpop.f32.mrb[3].mxu1  ;;  %692 = vmax.xlane.f32.xlu0 %v691_v45  ;;  %v845_v48 = vmul.f32 0.35355338, %v1545_v44  ;;  %v577_v44 = vstv %s2177_s16  ;;  %v588_v45 = vstv %s2179_s18  ;;  %s2262_s16 = sld [smem:[#allocation8 + $0x103]] }
 0x2ae   : > { %v844_v47 = vmul.f32 0.35355338, %v835_v46  ;;  %s2264_s18 = sld [smem:[#allocation8 + $0x183]] }
 0x2af   : > { %v849_v56 = vsel %vm532_vm3, %v845_v48, -inf }
 0x2b0   : > { %v1552_v49 = vpop.f32.mrb[4].mxu0  ;;  %v846_v50 = vsel %vm532_vm3, %v844_v47, -inf }
 0x2b1   : > { %v990_v52 = vpop.f32.mrb[5].mxu0  ;;  %847 = vmax.xlane.f32.xlu1 %v846_v50  ;;  %695 = vmax.xlane.f32.xlu0 %v694_v51  ;;  %v1000_v54 = vmul.f32 0.35355338, %v1552_v49  ;;  %v581_v50 = vstv %s2184_s20  ;;  %v592_v51 = vstv %s2186_s12 }
 0x2b2   : > { %v999_v53 = vmul.f32 0.35355338, %v990_v52 }
 0x2b3   : > { %v1004_v57 = vsel %vm532_vm3, %v1000_v54, -inf }
 0x2b4   : > { %v1001_v55 = vsel %vm532_vm3, %v999_v53, -inf }
 0x2b5   : > { %1002 = vmax.xlane.f32.xlu1 %v1001_v55  ;;  %850 = vmax.xlane.f32.xlu0 %v849_v56 }
 0x2b9   : > { %1005 = vmax.xlane.f32.xlu0 %v1004_v57 }
 0x335   : > { %v538_v58 = vpop.xlane.xlu1 %537 }
 0x336   : > { %v540_v59 = vsub.f32 %v531_v35, %v538_v58  ;;  %v535_v60 = vpop.xlane.xlu0 %534 }
 0x337   : > { %v539_v61 = vsub.f32 %v530_v37, %v535_v60  ;;  %v1483_v37 = vpack.c.bf16 %v2083_v8, %v2083_v8 }
 0x338   : > { %v543_v62 = vmul.f32 1.442695, %v540_v59 }
 0x339   : > { %v541_v63 = vmul.f32 1.442695, %v539_v61 }
 0x33a   : > { %1685 = vpow2.f32 %v543_v62  ;;  %v693_v0 = vpop.xlane.xlu0 %692 }
 0x33b   : > { %1687 = vpow2.f32 %v541_v63  ;;  %v697_v1 = vsub.f32 %v689_v42, %v693_v0 }
 0x33d   : > { %v699_v2 = vmul.f32 1.442695, %v697_v1 }
 0x33e   : > { %v848_v3 = vpop.xlane.xlu1 %847  ;;  %v696_v4 = vpop.xlane.xlu0 %695 }
 0x33f   : > { %1689 = vpow2.f32 %v699_v2  ;;  %v852_v5 = vsub.f32 %v844_v47, %v848_v3  ;;  %v698_v6 = vsub.f32 %v690_v43, %v696_v4  ;;  %v566_v43 = vstv %s2175_s17  ;;  %s2260_s17 = sld [smem:[#allocation8 + $0x83]] }
 0x340   : > { %v560_v47 = vstv %s2173_s15  ;;  %s2258_s15 = sld [smem:[#allocation8 + $0x3]] }
 0x341   : > { %v854_v7 = vmul.f32 1.442695, %v852_v5  ;;  %v701_v10 = vmul.f32 1.442695, %v698_v6 }
 0x342   : > { %v1003_v11 = vpop.xlane.xlu1 %1002  ;;  %v851_v12 = vpop.xlane.xlu0 %850 }
 0x343   : > { %1691 = vpow2.f32 %v854_v7  ;;  %v1007_v13 = vsub.f32 %v999_v53, %v1003_v11  ;;  %v853_v14 = vsub.f32 %v845_v48, %v851_v12  ;;  %v570_v48 = vstv %s2181_s19  ;;  %s1480_s19 = sshll.u32 %s2374_s25, 5 }
 0x344   : > { %v2135_v15 = vpop.eup %1685  ;;  %1693 = vpow2.f32 %v701_v10  ;;  %s2292_s11 = scalar_lea.vmem %s2351_s4, %s1480_s19 }
 0x345   : > { %v2137_v16 = vpop.eup %1687  ;;  %v1009_v17 = vmul.f32 1.442695, %v1007_v13  ;;  %v856_v18 = vmul.f32 1.442695, %v853_v14  ;;  %v548_v19 = vsel %vm532_vm3, %v2135_v15, 0.0  ;;  %v716_v14 = vstv %s2202_s29  ;;  %s1424_s29 = sshll.u32 %s2374_s25, 1 }
 0x346   : > { %549 = vadd.xlane.f32.xlu0 %v548_v19  ;;  %v1006_v20 = vpop.xlane.xlu0 %1005  ;;  %v545_v21 = vsel %vm532_vm3, %v2137_v16, 0.0  ;;  %v746_v19 = vstv %s2210_s27  ;;  %s336_s27 = scalar_lea.vmem %s2353_s6, %s1424_s29 }
 0x347   : > { %1695 = vpow2.f32 %v1009_v17  ;;  %v1008_v22 = vsub.f32 %v1000_v54, %v1006_v20  ;;  %546 = vadd.xlane.f32.xlu1 %v545_v21 }
 0x348   : > { %1697 = vpow2.f32 %v856_v18 }
 0x349   : > { %v2143_v23 = vpop.eup %1689  ;;  %v1011_v24 = vmul.f32 1.442695, %v1008_v22 }
 0x34a   : > { %v703_v25 = vsel %vm532_vm3, %v2143_v23, 0.0 }
 0x34b   : > { %1699 = vpow2.f32 %v1011_v24  ;;  %704 = vadd.xlane.f32.xlu1 %v703_v25 }
 0x34d   : > { %v2147_v26 = vpop.eup %1691 }
 0x34e   : > { %v2149_v27 = vpop.eup %1693  ;;  %v858_v28 = vsel %vm532_vm3, %v2147_v26, 0.0 }
 0x34f   : > { %859 = vadd.xlane.f32.xlu1 %v858_v28  ;;  %v706_v29 = vsel %vm532_vm3, %v2149_v27, 0.0 }
 0x350   : > { %707 = vadd.xlane.f32.xlu0 %v706_v29 }
 0x351   : > { %v2155_v30 = vpop.eup %1695 }
 0x352   : > { %v2157_v31 = vpop.eup %1697  ;;  %v1013_v32 = vsel %vm532_vm3, %v2155_v30, 0.0 }
 0x353   : > { %1014 = vadd.xlane.f32.xlu1 %v1013_v32  ;;  %v861_v33 = vsel %vm532_vm3, %v2157_v31, 0.0 }
 0x354   : > { %862 = vadd.xlane.f32.xlu0 %v861_v33 }
 0x355   : > { %v2163_v34 = vpop.eup %1699 }
 0x356   : > { %v1016_v35 = vsel %vm532_vm3, %v2163_v34, 0.0 }
 0x358   : > { %1017 = vadd.xlane.f32.xlu0 %v1016_v35 }
 0x364   : > { %431 = vrot.lane.b32.xlu1 %v1482_v36, %s1866_s24 }
 0x36e   : > { %433 = vrot.lane.b32.xlu0 %v1483_v37, %s1866_s24  ;;  %s2239_s24 = sld [smem:[#allocation8 + $0x102]] }
 0x3d3   : > { %v550_v38 = vpop.xlane.xlu0 %549 }
 0x3d4   : > { %1701 = vrcp.f32 %v550_v38  ;;  %v547_v39 = vpop.xlane.xlu1 %546 }
 0x3d5   : > { %1703 = vrcp.f32 %v547_v39 }
 0x3d8   : > { %v705_v8 = vpop.xlane.xlu1 %704 }
 0x3d9   : > { %1705 = vrcp.f32 %v705_v8 }
 0x3dc   : > { %v860_v9 = vpop.xlane.xlu1 %859 }
 0x3dd   : > { %v708_v41 = vpop.xlane.xlu0 %707 }
 0x3de   : > { %v1702_v42 = vpop.eup %1701  ;;  %1707 = vrcp.f32 %v708_v41 }
 0x3df   : > { %v1704_v46 = vpop.eup %1703  ;;  %v554_v49 = vmul.f32 %v1702_v42, %v2135_v15  ;;  %1709 = vrcp.f32 %v860_v9  ;;  %v726_v15 = vstv %s2206_s13 }
 0x3e0   : > { %v553_v52 = vmul.f32 %v1704_v46, %v2137_v16  ;;  %v2204_v53 = vpop.xlane.xlu1 %1014  ;;  %v736_v16 = vstv %s2208_s26 }
 0x3e1   : > { %v558_v54 = vmul.f32 %v556_v40, %v554_v49  ;;  %v568_v55 = vmul.f32 %v566_v43, %v554_v49  ;;  %v579_v56 = vmul.f32 %v577_v44, %v554_v49  ;;  %v590_v57 = vmul.f32 %v588_v45, %v554_v49  ;;  %v863_v58 = vpop.xlane.xlu0 %862 }
 0x3e2   : > { %v557_v59 = vmul.f32 %v556_v40, %v553_v52  ;;  %v567_v60 = vmul.f32 %v566_v43, %v553_v52  ;;  %v578_v61 = vmul.f32 %v577_v44, %v553_v52  ;;  %v589_v62 = vmul.f32 %v588_v45, %v553_v52 }
 0x3e3   : > { %v562_v63 = vadd.f32 %v560_v47, %v558_v54  ;;  %v572_v0 = vadd.f32 %v570_v48, %v568_v55  ;;  %v583_v1 = vadd.f32 %v581_v50, %v579_v56  ;;  %v594_v2 = vadd.f32 %v592_v51, %v590_v57  ;;  %v1706_v10 = vpop.eup %1705 }
 0x3e4   : > { %v561_v3 = vadd.f32 %v560_v47, %v557_v59  ;;  %v571_v4 = vadd.f32 %v570_v48, %v567_v60  ;;  %v582_v5 = vadd.f32 %v581_v50, %v578_v61  ;;  %v593_v6 = vadd.f32 %v592_v51, %v589_v62  ;;  %v432_v7 = vpop.permute.xlu1 %431 }
 0x3e5   : > { %564 = vst.msk [vmem:[#allocation2 + $0x8] sm:$0xff] %vm532_vm3, %v562_v63  ;;  %575 = vst.msk [vmem:[#allocation2 + $0x18] sm:$0xff] %vm532_vm3, %v572_v0  ;;  %v1018_v11 = vpop.xlane.xlu0 %1017  ;;  %1711 = vrcp.f32 %v863_v58  ;;  %v711_v13 = vmul.f32 %v1706_v10, %v2143_v23  ;;  %v871_v50 = vstv %s2233_s7  ;;  %v881_v51 = vstv %s2235_s10 }
 0x3e6   : > { %586 = vst.msk [vmem:[#allocation2 + $0x28] sm:$0xff] %vm532_vm3, %v583_v1  ;;  %597 = vst.msk [vmem:[#allocation2 + $0x38] sm:$0xff] %vm532_vm3, %v594_v2  ;;  %1713 = vrcp.f32 %v1018_v11  ;;  %v891_v52 = vstv %s2239_s24  ;;  %v901_v54 = vstv %s2241_s14 }
 0x3e7   : > { %438 = vst.msk [vmem:[%s2215_s30] sm:$0xf] %vm437_vm4, %v432_v7  ;;  %v717_v24 = vmul.f32 %v716_v14, %v711_v13  ;;  %v727_v25 = vmul.f32 %v726_v15, %v711_v13  ;;  %v737_v28 = vmul.f32 %v736_v16, %v711_v13  ;;  %v747_v37 = vmul.f32 %v746_v19, %v711_v13 }
 0x3e8   : > { %563 = vst.msk [vmem:[#allocation2] sm:$0xff] %vm532_vm3, %v561_v3  ;;  %574 = vst.msk [vmem:[#allocation2 + $0x10] sm:$0xff] %vm532_vm3, %v571_v4  ;;  %v1708_v12 = vpop.eup %1707  ;;  %1715 = vrcp.f32 %v2204_v53 }
 0x3e9   : > { %585 = vst.msk [vmem:[#allocation2 + $0x20] sm:$0xff] %vm532_vm3, %v582_v5  ;;  %596 = vst.msk [vmem:[#allocation2 + $0x30] sm:$0xff] %vm532_vm3, %v593_v6  ;;  %v712_v17 = vmul.f32 %v1708_v12, %v2149_v27  ;;  %v434_v18 = vpop.permute.xlu0 %433  ;;  %v1710_v44 = vpop.eup %1709 }
 0x3ea   : > { %439 = vst.msk [vmem:[%s2215_s30 + $0x4] sm:$0xf] %vm437_vm4, %v434_v18  ;;  %v866_v49 = vmul.f32 %v1710_v44, %v2147_v26  ;;  %v1026_v18 = vstv %s2258_s15 }
 0x3eb   : > { %v718_v20 = vmul.f32 %v716_v14, %v712_v17  ;;  %v728_v21 = vmul.f32 %v726_v15, %v712_v17  ;;  %v738_v22 = vmul.f32 %v736_v16, %v712_v17  ;;  %v748_v23 = vmul.f32 %v746_v19, %v712_v17 }
 0x3ec   : > { %v715_v27 = vld [vmem:[#allocation2 + $0x8] sm:$0xff]  ;;  %v725_v29 = vld [vmem:[#allocation2 + $0x18] sm:$0xff]  ;;  %v872_v57 = vmul.f32 %v871_v50, %v866_v49  ;;  %v882_v58 = vmul.f32 %v881_v51, %v866_v49  ;;  %v902_v59 = vmul.f32 %v901_v54, %v866_v49  ;;  %v1036_v19 = vstv %s2260_s17 }
 0x3ed   : > { %v735_v32 = vld [vmem:[#allocation2 + $0x28] sm:$0xff]  ;;  %v720_v38 = vadd.f32 %v718_v20, %v715_v27  ;;  %v730_v39 = vadd.f32 %v728_v21, %v725_v29  ;;  %v745_v43 = vld [vmem:[#allocation2 + $0x38] sm:$0xff]  ;;  %v1046_v20 = vstv %s2262_s16  ;;  %v1056_v21 = vstv %s2264_s18 }
 0x3ee   : > { %v740_v8 = vadd.f32 %v738_v22, %v735_v32  ;;  %v750_v46 = vadd.f32 %v748_v23, %v745_v43 }
 0x3ef   : > { %v714_v33 = vld [vmem:[#allocation2] sm:$0xff]  ;;  %v724_v35 = vld [vmem:[#allocation2 + $0x10] sm:$0xff]  ;;  %722 = vst.msk [vmem:[#allocation2 + $0x8] sm:$0xff] %vm532_vm3, %v720_v38  ;;  %732 = vst.msk [vmem:[#allocation2 + $0x18] sm:$0xff] %vm532_vm3, %v730_v39  ;;  %v1712_v47 = vpop.eup %1711 }
 0x3f0   : > { %v734_v36 = vld [vmem:[#allocation2 + $0x20] sm:$0xff]  ;;  %v744_v9 = vld [vmem:[#allocation2 + $0x30] sm:$0xff]  ;;  %v719_v40 = vadd.f32 %v717_v24, %v714_v33  ;;  %v729_v41 = vadd.f32 %v727_v25, %v724_v35  ;;  %742 = vst.msk [vmem:[#allocation2 + $0x28] sm:$0xff] %vm532_vm3, %v740_v8  ;;  %752 = vst.msk [vmem:[#allocation2 + $0x38] sm:$0xff] %vm532_vm3, %v750_v46  ;;  %v867_v48 = vmul.f32 %v1712_v47, %v2157_v31  ;;  %v1714_v5 = vpop.eup %1713 }
 0x3f1   : > { %v739_v42 = vadd.f32 %v737_v28, %v734_v36  ;;  %v749_v45 = vadd.f32 %v747_v37, %v744_v9  ;;  %v892_v31 = vmul.f32 %v891_v52, %v866_v49  ;;  %v1022_v16 = vmul.f32 %v1714_v5, %v2163_v34 }
 0x3f2   : > { %721 = vst.msk [vmem:[#allocation2] sm:$0xff] %vm532_vm3, %v719_v40  ;;  %731 = vst.msk [vmem:[#allocation2 + $0x10] sm:$0xff] %vm532_vm3, %v729_v41  ;;  %v873_v53 = vmul.f32 %v871_v50, %v867_v48  ;;  %v883_v55 = vmul.f32 %v881_v51, %v867_v48  ;;  %v893_v56 = vmul.f32 %v891_v52, %v867_v48  ;;  %v1716_v13 = vpop.eup %1715 }
 0x3f3   : > { %741 = vst.msk [vmem:[#allocation2 + $0x20] sm:$0xff] %vm532_vm3, %v739_v42  ;;  %751 = vst.msk [vmem:[#allocation2 + $0x30] sm:$0xff] %vm532_vm3, %v749_v45  ;;  %v903_v4 = vmul.f32 %v901_v54, %v867_v48  ;;  %v1021_v17 = vmul.f32 %v1716_v13, %v2155_v30  ;;  %v1028_v22 = vmul.f32 %v1026_v18, %v1022_v16 }
 0x3f4   : > { %v1038_v23 = vmul.f32 %v1036_v19, %v1022_v16  ;;  %v1048_v24 = vmul.f32 %v1046_v20, %v1022_v16  ;;  %v1058_v8 = vmul.f32 %v1056_v21, %v1022_v16 }
 0x3f5   : > { %v1027_v25 = vmul.f32 %v1026_v18, %v1021_v17  ;;  %v1037_v28 = vmul.f32 %v1036_v19, %v1021_v17  ;;  %v1047_v27 = vmul.f32 %v1046_v20, %v1021_v17  ;;  %v1057_v29 = vmul.f32 %v1056_v21, %v1021_v17 }
 0x3f6   : > { %v870_v26 = vld [vmem:[#allocation2 + $0x8] sm:$0xff]  ;;  %v880_v60 = vld [vmem:[#allocation2 + $0x18] sm:$0xff] }
 0x3f7   : > { %v890_v61 = vld [vmem:[#allocation2 + $0x28] sm:$0xff]  ;;  %v875_v1 = vadd.f32 %v873_v53, %v870_v26  ;;  %v885_v2 = vadd.f32 %v883_v55, %v880_v60  ;;  %v900_v12 = vld [vmem:[#allocation2 + $0x38] sm:$0xff] }
 0x3f8   : > { %v895_v3 = vadd.f32 %v893_v56, %v890_v61  ;;  %v905_v15 = vadd.f32 %v903_v4, %v900_v12 }
 0x3f9   : > { %v869_v62 = vld [vmem:[#allocation2] sm:$0xff]  ;;  %v879_v63 = vld [vmem:[#allocation2 + $0x10] sm:$0xff]  ;;  %877 = vst.msk [vmem:[#allocation2 + $0x8] sm:$0xff] %vm532_vm3, %v875_v1  ;;  %887 = vst.msk [vmem:[#allocation2 + $0x18] sm:$0xff] %vm532_vm3, %v885_v2 }
 0x3fa   : > { %v889_v0 = vld [vmem:[#allocation2 + $0x20] sm:$0xff]  ;;  %v899_v6 = vld [vmem:[#allocation2 + $0x30] sm:$0xff]  ;;  %v874_v7 = vadd.f32 %v872_v57, %v869_v62  ;;  %v884_v10 = vadd.f32 %v882_v58, %v879_v63  ;;  %897 = vst.msk [vmem:[#allocation2 + $0x28] sm:$0xff] %vm532_vm3, %v895_v3  ;;  %907 = vst.msk [vmem:[#allocation2 + $0x38] sm:$0xff] %vm532_vm3, %v905_v15 }
 0x3fb   : > { %v894_v11 = vadd.f32 %v892_v31, %v889_v0  ;;  %v904_v14 = vadd.f32 %v902_v59, %v899_v6 }
 0x3fc   : > { %876 = vst.msk [vmem:[#allocation2] sm:$0xff] %vm532_vm3, %v874_v7  ;;  %886 = vst.msk [vmem:[#allocation2 + $0x10] sm:$0xff] %vm532_vm3, %v884_v10 }
 0x3fd   : > { %896 = vst.msk [vmem:[#allocation2 + $0x20] sm:$0xff] %vm532_vm3, %v894_v11  ;;  %906 = vst.msk [vmem:[#allocation2 + $0x30] sm:$0xff] %vm532_vm3, %v904_v14 }
 0x400   : > { %v1025_v32 = vld [vmem:[#allocation2 + $0x8] sm:$0xff]  ;;  %v1035_v33 = vld [vmem:[#allocation2 + $0x18] sm:$0xff] }
 0x401   : > { %v1045_v35 = vld [vmem:[#allocation2 + $0x28] sm:$0xff]  ;;  %v1030_v34 = vadd.f32 %v1028_v22, %v1025_v32  ;;  %v1040_v39 = vadd.f32 %v1038_v23, %v1035_v33  ;;  %v1055_v43 = vld [vmem:[#allocation2 + $0x38] sm:$0xff] }
 0x402   : > { %v1050_v30 = vadd.f32 %v1048_v24, %v1045_v35  ;;  %v1060_v45 = vadd.f32 %v1058_v8, %v1055_v43 }
 0x403   : > { %v1024_v36 = vld [vmem:[#allocation2] sm:$0xff]  ;;  %v1034_v37 = vld [vmem:[#allocation2 + $0x10] sm:$0xff]  ;;  %1032 = vst.msk [vmem:[#allocation2 + $0x8] sm:$0xff] %vm532_vm3, %v1030_v34  ;;  %1042 = vst.msk [vmem:[#allocation2 + $0x18] sm:$0xff] %vm532_vm3, %v1040_v39 }
 0x404   : > { %v1044_v38 = vld [vmem:[#allocation2 + $0x20] sm:$0xff]  ;;  %v1054_v9 = vld [vmem:[#allocation2 + $0x30] sm:$0xff]  ;;  %v1029_v40 = vadd.f32 %v1027_v25, %v1024_v36  ;;  %v1039_v41 = vadd.f32 %v1037_v28, %v1034_v37  ;;  %1052 = vst.msk [vmem:[#allocation2 + $0x28] sm:$0xff] %vm532_vm3, %v1050_v30  ;;  %1062 = vst.msk [vmem:[#allocation2 + $0x38] sm:$0xff] %vm532_vm3, %v1060_v45 }
 0x405   : > { %v1049_v42 = vadd.f32 %v1047_v27, %v1044_v38  ;;  %v1059_v44 = vadd.f32 %v1057_v29, %v1054_v9 }
 0x406   : > { %1031 = vst.msk [vmem:[#allocation2] sm:$0xff] %vm532_vm3, %v1029_v40  ;;  %1041 = vst.msk [vmem:[#allocation2 + $0x10] sm:$0xff] %vm532_vm3, %v1039_v41 }
 0x407   : > { %1051 = vst.msk [vmem:[#allocation2 + $0x20] sm:$0xff] %vm532_vm3, %v1049_v42  ;;  %1061 = vst.msk [vmem:[#allocation2 + $0x30] sm:$0xff] %vm532_vm3, %v1059_v44 }
 0x40a   : > { %v1064_v46 = vld [vmem:[#allocation2 + $0x8] sm:$0xff]  ;;  %v1105_v47 = vld [vmem:[#allocation2 + $0x18] sm:$0xff] }
 0x40b   : > { %v1146_v48 = vld [vmem:[#allocation2 + $0x28] sm:$0xff]  ;;  %v1079_v49 = vsel %vm532_vm3, %v1064_v46, 0.0  ;;  %v1485_v50 = vpack.c.bf16 %v1064_v46, %v1064_v46  ;;  %v1487_v52 = vpack.c.bf16 %v1105_v47, %v1105_v47  ;;  %v1187_v58 = vld [vmem:[#allocation2 + $0x38] sm:$0xff]  ;;  %v1120_v60 = vsel %vm532_vm3, %v1105_v47, 0.0 }
 0x40c   : > { %1080 = vadd.xlane.f32.xlu0 %v1079_v49  ;;  %v1489_v31 = vpack.c.bf16 %v1146_v48, %v1146_v48  ;;  %v1491_v61 = vpack.c.bf16 %v1187_v58, %v1187_v58  ;;  %v1161_v0 = vsel %vm532_vm3, %v1146_v48, 0.0  ;;  %v1090_v1 = vmul.f32 %v1064_v46, %v1064_v46 }
 0x40d   : > { %v1063_v51 = vld [vmem:[#allocation2] sm:$0xff]  ;;  %v1104_v54 = vld [vmem:[#allocation2 + $0x10] sm:$0xff]  ;;  %1075 = vst.msk [vmem:[%s2292_s11 + $0x4] sm:$0xf] %vm1073_vm5, %v1485_v50  ;;  %1468 = vst.msk [vmem:[%s2292_s11 + $0xc] sm:$0xf] %vm1073_vm5, %v1487_v52  ;;  %v1131_v5 = vmul.f32 %v1105_v47, %v1105_v47  ;;  %v1172_v11 = vmul.f32 %v1146_v48, %v1146_v48  ;;  %v1213_v15 = vmul.f32 %v1187_v58, %v1187_v58 }
 0x40e   : > { %v1145_v53 = vld [vmem:[#allocation2 + $0x20] sm:$0xff]  ;;  %v1484_v55 = vpack.c.bf16 %v1063_v51, %v1063_v51  ;;  %v1076_v56 = vsel %vm532_vm3, %v1063_v51, 0.0  ;;  %v1486_v57 = vpack.c.bf16 %v1104_v54, %v1104_v54  ;;  %v1186_v26 = vld [vmem:[#allocation2 + $0x30] sm:$0xff]  ;;  %1472 = vst.msk [vmem:[%s2292_s11 + $0x14] sm:$0xf] %vm1073_vm5, %v1489_v31  ;;  %v1117_v62 = vsel %vm532_vm3, %v1104_v54, 0.0 }
 0x40f   : > { %1077 = vadd.xlane.f32.xlu1 %v1076_v56  ;;  %v1488_v59 = vpack.c.bf16 %v1145_v53, %v1145_v53  ;;  %1476 = vst.msk [vmem:[%s2292_s11 + $0x1c] sm:$0xf] %vm1073_vm5, %v1491_v61  ;;  %v1490_v63 = vpack.c.bf16 %v1186_v26, %v1186_v26  ;;  %v1158_v2 = vsel %vm532_vm3, %v1145_v53, 0.0  ;;  %v1089_v3 = vmul.f32 %v1063_v51, %v1063_v51 }
 0x410   : > { %1074 = vst.msk [vmem:[%s2292_s11] sm:$0xf] %vm1073_vm5, %v1484_v55  ;;  %1467 = vst.msk [vmem:[%s2292_s11 + $0x8] sm:$0xf] %vm1073_vm5, %v1486_v57  ;;  %1121 = vadd.xlane.f32.xlu0 %v1120_v60  ;;  %v1094_v4 = vsel %vm532_vm3, %v1090_v1, 0.0  ;;  %v1130_v7 = vmul.f32 %v1104_v54, %v1104_v54  ;;  %v1135_v10 = vsel %vm532_vm3, %v1131_v5, 0.0  ;;  %v1171_v13 = vmul.f32 %v1145_v53, %v1145_v53 }
 0x411   : > { %1471 = vst.msk [vmem:[%s2292_s11 + $0x10] sm:$0xf] %vm1073_vm5, %v1488_v59  ;;  %1475 = vst.msk [vmem:[%s2292_s11 + $0x18] sm:$0xf] %vm1073_vm5, %v1490_v63  ;;  %v1091_v6 = vsel %vm532_vm3, %v1089_v3, 0.0  ;;  %v1176_v14 = vsel %vm532_vm3, %v1172_v11, 0.0  ;;  %v1212_v17 = vmul.f32 %v1186_v26, %v1186_v26 }
 0x412   : > { %v1132_v12 = vsel %vm532_vm3, %v1130_v7, 0.0  ;;  %v1173_v16 = vsel %vm532_vm3, %v1171_v13, 0.0  ;;  %v1217_v18 = vsel %vm532_vm3, %v1213_v15, 0.0  ;;  %v1202_v20 = vsel %vm532_vm3, %v1187_v58, 0.0 }
 0x413   : > { %1118 = vadd.xlane.f32.xlu1 %v1117_v62  ;;  %v1214_v19 = vsel %vm532_vm3, %v1212_v17, 0.0  ;;  %v1199_v21 = vsel %vm532_vm3, %v1186_v26, 0.0 }
 0x414   : > { %1162 = vadd.xlane.f32.xlu0 %v1161_v0 }
 0x417   : > { %1159 = vadd.xlane.f32.xlu1 %v1158_v2 }
 0x418   : > { %1095 = vadd.xlane.f32.xlu0 %v1094_v4 }
 0x41b   : > { %1092 = vadd.xlane.f32.xlu1 %v1091_v6 }
 0x41c   : > { %1136 = vadd.xlane.f32.xlu0 %v1135_v10 }
 0x41f   : > { %1133 = vadd.xlane.f32.xlu1 %v1132_v12 }
 0x420   : > { %1177 = vadd.xlane.f32.xlu0 %v1176_v14 }
 0x423   : > { %1174 = vadd.xlane.f32.xlu1 %v1173_v16 }
 0x424   : > { %1218 = vadd.xlane.f32.xlu0 %v1217_v18 }
 0x427   : > { %1215 = vadd.xlane.f32.xlu1 %v1214_v19 }
 0x428   : > { %1203 = vadd.xlane.f32.xlu0 %v1202_v20 }
 0x42b   : > { %1200 = vadd.xlane.f32.xlu1 %v1199_v21 }
 0x499   : > { %v1081_v22 = vpop.xlane.xlu0 %1080 }
 0x49c   : > { %v1078_v23 = vpop.xlane.xlu1 %1077 }
 0x49d   : > { %v1122_v24 = vpop.xlane.xlu0 %1121  ;;  %v1082_v36 = vadd.f32 %v1081_v22, %v1078_v23 }
 0x49f   : > { %v1083_v9 = vrot.slane %v1082_v36, 4 }
 0x4a0   : > { %v1119_v25 = vpop.xlane.xlu1 %1118 }
 0x4a1   : > { %v1163_v28 = vpop.xlane.xlu0 %1162  ;;  %v1123_v32 = vadd.f32 %v1122_v24, %v1119_v25  ;;  %v1084_v48 = vadd.f32 %v1083_v9, %v1082_v36 }
 0x4a3   : > { %v1124_v39 = vrot.slane %v1123_v32, 4  ;;  %v1085_v31 = vrot.slane %v1084_v48, 2 }
 0x4a4   : > { %v1160_v27 = vpop.xlane.xlu1 %1159 }
 0x4a5   : > { %v1096_v29 = vpop.xlane.xlu0 %1095  ;;  %v1164_v37 = vadd.f32 %v1163_v28, %v1160_v27  ;;  %v1125_v44 = vadd.f32 %v1124_v39, %v1123_v32  ;;  %v1086_v5 = vadd.f32 %v1085_v31, %v1084_v48 }
 0x4a7   : > { %v1165_v40 = vrot.slane %v1164_v37, 4  ;;  %v1126_v53 = vrot.slane %v1125_v44, 2  ;;  %v1087_v19 = vrot.slane %v1086_v5, 1 }
 0x4a8   : > { %v1093_v33 = vpop.xlane.xlu1 %1092 }
 0x4a9   : > { %v1097_v35 = vadd.f32 %v1096_v29, %v1093_v33  ;;  %v1137_v34 = vpop.xlane.xlu0 %1136  ;;  %v1166_v49 = vadd.f32 %v1165_v40, %v1164_v37  ;;  %v1127_v63 = vadd.f32 %v1126_v53, %v1125_v44  ;;  %v1088_v32 = vadd.f32 %v1087_v19, %v1086_v5 }
 0x4ab   : > { %v1098_v38 = vrot.slane %v1097_v35, 4  ;;  %v1167_v59 = vrot.slane %v1166_v49, 2  ;;  %v1128_v13 = vrot.slane %v1127_v63, 1 }
 0x4ac   : > { %v1134_v30 = vpop.xlane.xlu1 %1133 }
 0x4ad   : > { %v1138_v8 = vadd.f32 %v1137_v34, %v1134_v30  ;;  %v1099_v41 = vadd.f32 %v1098_v38, %v1097_v35  ;;  %v1178_v43 = vpop.xlane.xlu0 %1177  ;;  %v1168_v6 = vadd.f32 %v1167_v59, %v1166_v49  ;;  %v1129_v23 = vadd.f32 %v1128_v13, %v1127_v63 }
 0x4af   : > { %v1139_v42 = vrot.slane %v1138_v8, 4  ;;  %v1100_v50 = vrot.slane %v1099_v41, 2  ;;  %v1169_v17 = vrot.slane %v1168_v6, 1  ;;  %v1228_v36 = vsel %vm1227_vm6, %v1088_v32, %v1129_v23 }
 0x4b0   : > { %v1175_v45 = vpop.xlane.xlu1 %1174 }
 0x4b1   : > { %v1140_v46 = vadd.f32 %v1139_v42, %v1138_v8  ;;  %v1179_v47 = vadd.f32 %v1178_v43, %v1175_v45  ;;  %v1219_v54 = vpop.xlane.xlu0 %1218  ;;  %v1101_v26 = vadd.f32 %v1100_v50, %v1099_v41  ;;  %v1170_v27 = vadd.f32 %v1169_v17, %v1168_v6 }
 0x4b3   : > { %v1141_v51 = vrot.slane %v1140_v46, 2  ;;  %v1180_v52 = vrot.slane %v1179_v47, 4  ;;  %v1102_v7 = vrot.slane %v1101_v26, 1  ;;  %v1230_v38 = vsel %vm1229_vm7, %v1228_v36, %v1170_v27 }
 0x4b4   : > { %v1216_v55 = vpop.xlane.xlu1 %1215 }
 0x4b5   : > { %v1142_v56 = vadd.f32 %v1141_v51, %v1140_v46  ;;  %v1181_v57 = vadd.f32 %v1180_v52, %v1179_v47  ;;  %v1220_v58 = vadd.f32 %v1219_v54, %v1216_v55  ;;  %v1204_v62 = vpop.xlane.xlu0 %1203  ;;  %v1103_v20 = vadd.f32 %v1102_v7, %v1101_v26 }
 0x4b7   : > { %v1182_v60 = vrot.slane %v1181_v57, 2  ;;  %v1221_v61 = vrot.slane %v1220_v58, 4  ;;  %v1143_v1 = vrot.slane %v1142_v56, 1 }
 0x4b8   : > { %v1201_v0 = vpop.xlane.xlu1 %1200 }
 0x4b9   : > { %v1183_v2 = vadd.f32 %v1182_v60, %v1181_v57  ;;  %v1222_v3 = vadd.f32 %v1221_v61, %v1220_v58  ;;  %v1205_v4 = vadd.f32 %v1204_v62, %v1201_v0  ;;  %v1144_v14 = vadd.f32 %v1143_v1, %v1142_v56 }
 0x4bb   : > { %v1184_v10 = vrot.slane %v1183_v2, 1  ;;  %v1223_v11 = vrot.slane %v1222_v3, 2  ;;  %v1206_v12 = vrot.slane %v1205_v4, 4  ;;  %v1233_v24 = vsel %vm1227_vm6, %v1103_v20, %v1144_v14 }
 0x4bd   : > { %v1224_v15 = vadd.f32 %v1223_v11, %v1222_v3  ;;  %v1207_v16 = vadd.f32 %v1206_v12, %v1205_v4  ;;  %v1185_v18 = vadd.f32 %v1184_v10, %v1183_v2 }
 0x4bf   : > { %v1225_v21 = vrot.slane %v1224_v15, 1  ;;  %v1208_v22 = vrot.slane %v1207_v16, 2  ;;  %v1234_v29 = vsel %vm1229_vm7, %v1233_v24, %v1185_v18 }
 0x4c1   : > { %v1226_v25 = vadd.f32 %v1225_v21, %v1224_v15  ;;  %v1209_v28 = vadd.f32 %v1208_v22, %v1207_v16 }
 0x4c3   : > { %v1235_v33 = vsel %vm1231_vm8, %v1234_v29, %v1226_v25  ;;  %v1210_v35 = vrot.slane %v1209_v28, 1 }
 0x4c4   : > { %v1237_v34 = vrot.slane %v1235_v33, 7 }
 0x4c5   : > { %v1211_v37 = vadd.f32 %v1210_v35, %v1209_v28 }
 0x4c7   : > { %v1232_v39 = vsel %vm1231_vm8, %v1230_v38, %v1211_v37 }
 0x4c8   : > { %v1240_v30 = vsel %vm1239_vm9, %v1232_v39, %v1237_v34 }
 0x4c9   : > { %1242 = vst.msk [vmem:[%s336_s27] sm:$0x3] %vm1241_vm10, %v1240_v30 }
 0x4ca PF: > { %p20_p6 = scmp.ge.s32.totalorder %s2008_s8, 4   ;;  %s2369_s21 = smov %s1843_s22 }
 0x4cb   : > { %s2370_s22 = smov %s1847_s23  ;;  %s2371_s23 = smov %s2018_s9 }
 0x4cc   : > { %s2372_s24 = smov %s2008_s8  ;;  %22 = sbr.rel (!%p20_p6) target bundleno = 6 (0x6), region = 119 }
 0x4d3   :  { %1294 = vsyncpa [#allocation4], 1 }
 0x4d4   :  { %1296 = vsyncpa [#allocation4 + $0x1], 1 }
 0x4d5   :  { %1297 = vsyncpa [#allocation7], 1 }
 0x4d6   :  { %1298 = vsyncpa [#allocation5], 1 }
 0x4d7   :  { %1300 = vsyncpa [#allocation5 + $0x1], 1 }
 0x4d8   :  { %1301 = vsyncpa [#allocation10], 1 }

</bundles_post_ra>
